<compile_context>
chip_gen: v6e
topology: v6e:2x2x1
jax: 0.10.0
libtpu: 0.0.40
codegen_flags: <defaults>
</compile_context>

<pallas_src>
import functools

import jax
import jax.numpy as jnp
from jax.experimental import pallas as pl
from jax.experimental.pallas import tpu as pltpu


def _round_up(x: int, m: int) -> int:
    return (x + m - 1) // m * m


# ----------------------------- Pallas kernels ------------------------------


def _conv_matmul_kernel(x_ref, w_ref, b_ref, o_ref):
    # x: [tm, K] bf16, w: [K, N] bf16, b: [1, N] f32 -> o: [tm, N] bf16
    acc = jnp.dot(x_ref[...], w_ref[...], preferred_element_type=jnp.float32)
    acc = jnp.maximum(acc + b_ref[...], 0.0)
    o_ref[...] = acc.astype(o_ref.dtype)


def _tail_kernel(x_ref, w2_ref, b2_ref, w3_ref, b3_ref, w4_ref, b4_ref, o_ref,
                 *, action_num: int, atoms_p: int):
    # Fused conv2 (1x1 output spatial -> dense) + fc1 + fc2 + per-action softmax.
    # x: [Bp, 3*3*64] bf16 (NHWC-flat conv1 output)
    x = x_ref[...]
    h = jnp.dot(x, w2_ref[...], preferred_element_type=jnp.float32) + b2_ref[...]
    h = jnp.maximum(h, 0.0).astype(jnp.bfloat16)                      # conv2 + ReLU
    h = jnp.dot(h, w3_ref[...], preferred_element_type=jnp.float32) + b3_ref[...]
    h = jnp.maximum(h, 0.0).astype(jnp.bfloat16)                      # fc1 + ReLU
    # fc2 as a single lane-dense MXU matmul: [Bp, 512] @ [512, A*atoms_p]
    logits = jnp.dot(h, w4_ref[...], preferred_element_type=jnp.float32)
    logits = logits + b4_ref[...]                                     # [Bp, A*atoms_p]
    # Per-action softmax over vreg-aligned 128-lane groups (static unroll).
    for a in range(action_num):
        lo = a * atoms_p
        g = logits[:, lo:lo + atoms_p]
        m = jnp.max(g, axis=-1, keepdims=True)                        # f32 softmax
        e = jnp.exp(g - m)
        s = jnp.sum(e, axis=-1, keepdims=True)
        o_ref[:, lo:lo + atoms_p] = e / s


# ------------------------------ kernel wrappers -----------------------------


def matmul_bias_relu(x, w_bf16, b_f32, *, max_tile_m: int = 256):
    """relu(x @ w + b); x: [M, K], w: [K, N] bf16, b: [1, N] f32 -> [M, N] bf16."""
    M, K = x.shape
    Kw, N = w_bf16.shape
    assert K == Kw
    Mp = _round_up(M, 8)
    if Mp <= max_tile_m:
        tm = Mp
    else:
        tm = max_tile_m
        Mp = _round_up(M, tm)
    xp = x.astype(jnp.bfloat16)
    if Mp != M:
        xp = jnp.pad(xp, ((0, Mp - M), (0, 0)))
    flops = 2 * Mp * K * N
    bytes_accessed = 2 * (Mp * K + K * N + Mp * N) + 4 * N
    out = pl.pallas_call(
        _conv_matmul_kernel,
        out_shape=jax.ShapeDtypeStruct((Mp, N), jnp.bfloat16),
        grid=(Mp // tm,),
        in_specs=[
            pl.BlockSpec((tm, K), lambda i: (i, 0)),
            pl.BlockSpec((K, N), lambda i: (0, 0)),
            pl.BlockSpec((1, N), lambda i: (0, 0)),
        ],
        out_specs=pl.BlockSpec((tm, N), lambda i: (i, 0)),
        compiler_params=pltpu.CompilerParams(dimension_semantics=("parallel",)),
        cost_estimate=pl.CostEstimate(flops=flops, transcendentals=0,
                                      bytes_accessed=bytes_accessed),
    )(xp, w_bf16, b_f32)
    return out[:M] if Mp != M else out


def fused_head(feat, params, action_num: int, atoms_p: int):
    """feat: [B, 3*3*64] -> per-action softmax probs [B, action_num*atoms_p] f32."""
    B, _ = feat.shape
    Bp = _round_up(B, 8)
    xp = feat.astype(jnp.bfloat16)
    if Bp != B:
        xp = jnp.pad(xp, ((0, Bp - B), (0, 0)))
    vmem = pl.BlockSpec(memory_space=pltpu.MemorySpace.VMEM)
    out = pl.pallas_call(
        functools.partial(_tail_kernel, action_num=action_num, atoms_p=atoms_p),
        out_shape=jax.ShapeDtypeStruct((Bp, action_num * atoms_p), jnp.float32),
        in_specs=[vmem] * 7,
        out_specs=vmem,
    )(xp, params["conv2_w"], params["conv2_b"],
      params["fc1_w"], params["fc1_b"],
      params["fc2_w"], params["fc2_b"])
    return out[:B]


# ------------------------------- glue (JAX) ---------------------------------


def im2col_nhwc(x, kh, kw, stride):
    """x: [B, H, W, C] -> patches [B*Ho*Wo, kh*kw*C], ordering (kh, kw, C), C fastest."""
    B, H, W, C = x.shape
    Ho = (H - kh) // stride + 1
    Wo = (W - kw) // stride + 1
    cols = []
    for i in range(kh):
        for j in range(kw):
            cols.append(x[:, i:i + stride * Ho:stride, j:j + stride * Wo:stride, :])
    p = jnp.concatenate(cols, axis=-1)                  # [B, Ho, Wo, kh*kw*C]
    return p.reshape(B * Ho * Wo, kh * kw * C), Ho, Wo


# ------------------------------ parameter init ------------------------------


def _uniform_init(key, shape, fan_in):
    bound = 1.0 / jnp.sqrt(jnp.float32(fan_in))
    return jax.random.uniform(key, shape, jnp.float32, -bound, bound)


def init_c51_params(key, in_channels, action_num, num_atoms, spatial):
    """PyTorch-default-style init (uniform +-1/sqrt(fan_in)); weights pre-packed
    for the NHWC im2col matmul layout and pre-cast to bf16 for the MXU."""
    params = {}
    keys = jax.random.split(key, 10)
    conv_cfg = [(in_channels, 32, 8, 4), (32, 64, 4, 2), (64, 64, 3, 1)]
    h = spatial
    for li, (cin, cout, k, s) in enumerate(conv_cfg):
        fan_in = cin * k * k
        w = _uniform_init(keys[2 * li], (cout, cin, k, k), fan_in)   # torch layout
        b = _uniform_init(keys[2 * li + 1], (cout,), fan_in)
        # pack to [kh*kw*cin, cout] matching the NHWC im2col patch ordering
        params[f"conv{li}_w"] = (
            w.transpose(2, 3, 1, 0).reshape(k * k * cin, cout).astype(jnp.bfloat16))
        params[f"conv{li}_b"] = b.reshape(1, cout).astype(jnp.float32)
        h = (h - k) // s + 1
    flat_dim = 64 * h * h
    out_dim = action_num * num_atoms
    atoms_p = _round_up(num_atoms, 128)                 # vreg-aligned atom groups
    fc1_w = _uniform_init(keys[6], (flat_dim, 512), flat_dim)
    fc1_b = _uniform_init(keys[7], (512,), flat_dim)
    fc2_w = _uniform_init(keys[8], (512, out_dim), 512)
    fc2_b = _uniform_init(keys[9], (out_dim,), 512)
    params["fc1_w"] = fc1_w.astype(jnp.bfloat16)
    params["fc1_b"] = fc1_b.reshape(1, 512).astype(jnp.float32)
    # fc2 packed as one lane-dense [512, A*atoms_p] matrix; the atom axis of
    # each action is padded to atoms_p lanes with weight 0 and bias -1e30 so
    # the in-kernel softmax assigns those lanes exactly 0.
    w4 = fc2_w.reshape(512, action_num, num_atoms)
    w4 = jnp.pad(w4, ((0, 0), (0, 0), (0, atoms_p - num_atoms)))
    params["fc2_w"] = w4.reshape(512, action_num * atoms_p).astype(jnp.bfloat16)
    b4 = fc2_b.reshape(action_num, num_atoms)
    b4 = jnp.pad(b4, ((0, 0), (0, atoms_p - num_atoms)), constant_values=-1e30)
    params["fc2_b"] = b4.reshape(1, action_num * atoms_p).astype(jnp.float32)
    return params


# -------------------------------- forward -----------------------------------


@functools.partial(jax.jit, static_argnums=(2, 3))
def c51_forward(params, obs, action_num, num_atoms):
    """obs: [B, C, H, W] f32 (torch NCHW) -> probs [B, action_num, num_atoms]."""
    x = obs.astype(jnp.float32).transpose(0, 2, 3, 1)       # single NCHW->NHWC relayout
    B = x.shape[0]
    # conv0 + ReLU
    p0, ho, wo = im2col_nhwc(x, 8, 8, 4)
    y0 = matmul_bias_relu(p0, params["conv0_w"], params["conv0_b"])
    y0 = y0.reshape(B, ho, wo, 32)
    # conv1 + ReLU
    p1, ho, wo = im2col_nhwc(y0, 4, 4, 2)
    y1 = matmul_bias_relu(p1, params["conv1_w"], params["conv1_b"])
    y1 = y1.reshape(B, ho, wo, 64)
    # Fused tail assumes conv2 (3x3, stride 1) reduces spatial to 1x1 (true for
    # 36x36 inputs, where NHWC-flat == NCHW-flat so torch flatten order matches).
    # TODO(synk): larger inputs (e.g. 84x84) need a separate conv2 im2col matmul
    # call (plus an HWC->CHW flatten reorder) before the fc head.
    assert ho == 3 and wo == 3, (ho, wo)
    feat = y1.reshape(B, ho * wo * 64)
    atoms_p = _round_up(num_atoms, 128)
    probs = fused_head(feat, params, action_num, atoms_p)   # [B, A*atoms_p] f32
    probs = probs.reshape(B, action_num, atoms_p)[:, :, :num_atoms]
    return probs


# ---------------------------------- main -------------------------------------


if __name__ == "__main__":
    # Small C51 config: state_shape=(4, 36, 36), 6 actions, 51 atoms, batch=2.
    B, C, H = 2, 4, 36
    action_num, num_atoms = 6, 51

    key = jax.random.PRNGKey(0)
    k_params, k_obs = jax.random.split(key)
    params = init_c51_params(k_params, C, action_num, num_atoms, H)
    obs = jax.random.normal(k_obs, (B, C, H, H), dtype=jnp.float32)

    out = c51_forward(params, obs, action_num, num_atoms)
    out = jax.block_until_ready(out)

    assert out.shape == (B, action_num, num_atoms), out.shape
    # distributions sum to 1 along the atom axis (softmax done in f32 in-kernel)
    sums = jnp.sum(out, axis=-1)
    assert bool(jnp.all(jnp.abs(sums - 1.0) < 1e-4)), "softmax rows do not sum to 1"
    assert bool(jnp.all(out >= 0.0)), "negative probabilities"
    print("KERNEL_OK")
</pallas_src>

<mosaic_0001>
module attributes {stable_mosaic.version = 11 : i64} {
  func.func @_conv_matmul_kernel(%arg0: i32, %arg1: memref<128x256xbf16, #tpu.memory_space<vmem>>, %arg2: memref<256x32xbf16, #tpu.memory_space<vmem>>, %arg3: memref<1x32xf32, #tpu.memory_space<vmem>>, %arg4: memref<128x32xbf16, #tpu.memory_space<vmem>>) attributes {dimension_semantics = [#tpu.dimension_semantics<parallel>], iteration_bounds = array<i64: 1>, scalar_prefetch = 0 : i64, scratch_operands = 0 : i64, tpu.core_type = #tpu.core_type<tc>, window_params = [{transform_indices = @transform_0, window_bounds = array<i64: 128, 256>}, {pipeline_mode = #tpu.pipeline_mode<synchronous>, transform_indices = @transform_1, window_bounds = array<i64: 256, 32>}, {pipeline_mode = #tpu.pipeline_mode<synchronous>, transform_indices = @transform_2, window_bounds = array<i64: 1, 32>}, {transform_indices = @transform_3, window_bounds = array<i64: 128, 32>}]} {
    %c0 = arith.constant 0 : index
    %c0_0 = arith.constant 0 : index
    %0 = vector.load %arg1[%c0, %c0_0] : memref<128x256xbf16, #tpu.memory_space<vmem>>, vector<128x256xbf16>
    %c0_1 = arith.constant 0 : index
    %c0_2 = arith.constant 0 : index
    %1 = vector.load %arg2[%c0_1, %c0_2] : memref<256x32xbf16, #tpu.memory_space<vmem>>, vector<256x32xbf16>
    %cst = arith.constant dense<0.000000e+00> : vector<128x32xf32>
    %2 = tpu.matmul %0, %1, %cst {dimension_numbers = #tpu.dot_dimension_numbers<[1], [0], [0], [1], [0, 0, 1, 1], [], []>} : vector<128x256xbf16>, vector<256x32xbf16>, vector<128x32xf32> -> vector<128x32xf32>
    %c0_3 = arith.constant 0 : index
    %c0_4 = arith.constant 0 : index
    %3 = vector.load %arg3[%c0_3, %c0_4] : memref<1x32xf32, #tpu.memory_space<vmem>>, vector<1x32xf32>
    %4 = vector.broadcast %3 : vector<1x32xf32> to vector<128x32xf32>
    %5 = arith.addf %2, %4 : vector<128x32xf32>
    %cst_5 = arith.constant 0.000000e+00 : f32
    %6 = vector.broadcast %cst_5 : f32 to vector<128x32xf32>
    %7 = arith.maximumf %5, %6 : vector<128x32xf32>
    %8 = arith.truncf %7 : vector<128x32xf32> to vector<128x32xbf16>
    %c0_6 = arith.constant 0 : index
    %c0_7 = arith.constant 0 : index
    %9 = vector.load %arg4[%c0_6, %c0_7] : memref<128x32xbf16, #tpu.memory_space<vmem>>, vector<128x32xbf16>
    tpu.vector_store %arg4[%c0_6, %c0_7], %8 {strides = array<i32>} : memref<128x32xbf16, #tpu.memory_space<vmem>>, vector<128x32xbf16>,
    return
  }
  func.func @transform_0(%arg0: i32) -> (i32, i32) {
    %c0_i32 = arith.constant 0 : i32
    %c0_i32_0 = arith.constant 0 : i32
    return %arg0, %c0_i32 : i32, i32
  }
  func.func @transform_1(%arg0: i32) -> (i32, i32) {
    %c0_i32 = arith.constant 0 : i32
    %c0_i32_0 = arith.constant 0 : i32
    %c0_i32_1 = arith.constant 0 : i32
    return %c0_i32, %c0_i32_0 : i32, i32
  }
  func.func @transform_2(%arg0: i32) -> (i32, i32) {
    %c0_i32 = arith.constant 0 : i32
    %c0_i32_0 = arith.constant 0 : i32
    %c0_i32_1 = arith.constant 0 : i32
    return %c0_i32, %c0_i32_0 : i32, i32
  }
  func.func @transform_3(%arg0: i32) -> (i32, i32) {
    %c0_i32 = arith.constant 0 : i32
    %c0_i32_0 = arith.constant 0 : i32
    return %arg0, %c0_i32 : i32, i32
  }
}

module attributes {stable_mosaic.version = 11 : i64} {
  func.func @_conv_matmul_kernel(%arg0: i32, %arg1: memref<24x512xbf16, #tpu.memory_space<vmem>>, %arg2: memref<512x64xbf16, #tpu.memory_space<vmem>>, %arg3: memref<1x64xf32, #tpu.memory_space<vmem>>, %arg4: memref<24x64xbf16, #tpu.memory_space<vmem>>) attributes {dimension_semantics = [#tpu.dimension_semantics<parallel>], iteration_bounds = array<i64: 1>, scalar_prefetch = 0 : i64, scratch_operands = 0 : i64, tpu.core_type = #tpu.core_type<tc>, window_params = [{transform_indices = @transform_0, window_bounds = array<i64: 24, 512>}, {pipeline_mode = #tpu.pipeline_mode<synchronous>, transform_indices = @transform_1, window_bounds = array<i64: 512, 64>}, {pipeline_mode = #tpu.pipeline_mode<synchronous>, transform_indices = @transform_2, window_bounds = array<i64: 1, 64>}, {transform_indices = @transform_3, window_bounds = array<i64: 24, 64>}]} {
    %c0 = arith.constant 0 : index
    %c0_0 = arith.constant 0 : index
    %0 = vector.load %arg1[%c0, %c0_0] : memref<24x512xbf16, #tpu.memory_space<vmem>>, vector<24x512xbf16>
    %c0_1 = arith.constant 0 : index
    %c0_2 = arith.constant 0 : index
    %1 = vector.load %arg2[%c0_1, %c0_2] : memref<512x64xbf16, #tpu.memory_space<vmem>>, vector<512x64xbf16>
    %cst = arith.constant dense<0.000000e+00> : vector<24x64xf32>
    %2 = tpu.matmul %0, %1, %cst {dimension_numbers = #tpu.dot_dimension_numbers<[1], [0], [0], [1], [0, 0, 1, 1], [], []>} : vector<24x512xbf16>, vector<512x64xbf16>, vector<24x64xf32> -> vector<24x64xf32>
    %c0_3 = arith.constant 0 : index
    %c0_4 = arith.constant 0 : index
    %3 = vector.load %arg3[%c0_3, %c0_4] : memref<1x64xf32, #tpu.memory_space<vmem>>, vector<1x64xf32>
    %4 = vector.broadcast %3 : vector<1x64xf32> to vector<24x64xf32>
    %5 = arith.addf %2, %4 : vector<24x64xf32>
    %cst_5 = arith.constant 0.000000e+00 : f32
    %6 = vector.broadcast %cst_5 : f32 to vector<24x64xf32>
    %7 = arith.maximumf %5, %6 : vector<24x64xf32>
    %8 = arith.truncf %7 : vector<24x64xf32> to vector<24x64xbf16>
    %c0_6 = arith.constant 0 : index
    %c0_7 = arith.constant 0 : index
    %9 = vector.load %arg4[%c0_6, %c0_7] : memref<24x64xbf16, #tpu.memory_space<vmem>>, vector<24x64xbf16>
    tpu.vector_store %arg4[%c0_6, %c0_7], %8 {strides = array<i32>} : memref<24x64xbf16, #tpu.memory_space<vmem>>, vector<24x64xbf16>,
    return
  }
  func.func @transform_0(%arg0: i32) -> (i32, i32) {
    %c0_i32 = arith.constant 0 : i32
    %c0_i32_0 = arith.constant 0 : i32
    return %arg0, %c0_i32 : i32, i32
  }
  func.func @transform_1(%arg0: i32) -> (i32, i32) {
    %c0_i32 = arith.constant 0 : i32
    %c0_i32_0 = arith.constant 0 : i32
    %c0_i32_1 = arith.constant 0 : i32
    return %c0_i32, %c0_i32_0 : i32, i32
  }
  func.func @transform_2(%arg0: i32) -> (i32, i32) {
    %c0_i32 = arith.constant 0 : i32
    %c0_i32_0 = arith.constant 0 : i32
    %c0_i32_1 = arith.constant 0 : i32
    return %c0_i32, %c0_i32_0 : i32, i32
  }
  func.func @transform_3(%arg0: i32) -> (i32, i32) {
    %c0_i32 = arith.constant 0 : i32
    %c0_i32_0 = arith.constant 0 : i32
    return %arg0, %c0_i32 : i32, i32
  }
}

module attributes {stable_mosaic.version = 11 : i64} {
  func.func @_tail_kernel(%arg0: memref<8x576xbf16, #tpu.memory_space<vmem>>, %arg1: memref<576x64xbf16, #tpu.memory_space<vmem>>, %arg2: memref<1x64xf32, #tpu.memory_space<vmem>>, %arg3: memref<64x512xbf16, #tpu.memory_space<vmem>>, %arg4: memref<1x512xf32, #tpu.memory_space<vmem>>, %arg5: memref<512x768xbf16, #tpu.memory_space<vmem>>, %arg6: memref<1x768xf32, #tpu.memory_space<vmem>>, %arg7: memref<8x768xf32, #tpu.memory_space<vmem>>) attributes {dimension_semantics = [], scalar_prefetch = 0 : i64, scratch_operands = 0 : i64, tpu.core_type = #tpu.core_type<tc>} {
    %c0 = arith.constant 0 : index
    %c0_0 = arith.constant 0 : index
    %0 = vector.load %arg0[%c0, %c0_0] : memref<8x576xbf16, #tpu.memory_space<vmem>>, vector<8x576xbf16>
    %c0_1 = arith.constant 0 : index
    %c0_2 = arith.constant 0 : index
    %1 = vector.load %arg1[%c0_1, %c0_2] : memref<576x64xbf16, #tpu.memory_space<vmem>>, vector<576x64xbf16>
    %cst = arith.constant dense<0.000000e+00> : vector<8x64xf32>
    %2 = tpu.matmul %0, %1, %cst {dimension_numbers = #tpu.dot_dimension_numbers<[1], [0], [0], [1], [0, 0, 1, 1], [], []>} : vector<8x576xbf16>, vector<576x64xbf16>, vector<8x64xf32> -> vector<8x64xf32>
    %c0_3 = arith.constant 0 : index
    %c0_4 = arith.constant 0 : index
    %3 = vector.load %arg2[%c0_3, %c0_4] : memref<1x64xf32, #tpu.memory_space<vmem>>, vector<1x64xf32>
    %4 = vector.broadcast %3 : vector<1x64xf32> to vector<8x64xf32>
    %5 = arith.addf %2, %4 : vector<8x64xf32>
    %cst_5 = arith.constant 0.000000e+00 : f32
    %6 = vector.broadcast %cst_5 : f32 to vector<8x64xf32>
    %7 = arith.maximumf %5, %6 : vector<8x64xf32>
    %8 = arith.truncf %7 : vector<8x64xf32> to vector<8x64xbf16>
    %c0_6 = arith.constant 0 : index
    %c0_7 = arith.constant 0 : index
    %9 = vector.load %arg3[%c0_6, %c0_7] : memref<64x512xbf16, #tpu.memory_space<vmem>>, vector<64x512xbf16>
    %cst_8 = arith.constant dense<0.000000e+00> : vector<8x512xf32>
    %10 = tpu.matmul %8, %9, %cst_8 {dimension_numbers = #tpu.dot_dimension_numbers<[1], [0], [0], [1], [0, 0, 1, 1], [], []>} : vector<8x64xbf16>, vector<64x512xbf16>, vector<8x512xf32> -> vector<8x512xf32>
    %c0_9 = arith.constant 0 : index
    %c0_10 = arith.constant 0 : index
    %11 = vector.load %arg4[%c0_9, %c0_10] : memref<1x512xf32, #tpu.memory_space<vmem>>, vector<1x512xf32>
    %12 = vector.broadcast %11 : vector<1x512xf32> to vector<8x512xf32>
    %13 = arith.addf %10, %12 : vector<8x512xf32>
    %cst_11 = arith.constant 0.000000e+00 : f32
    %14 = vector.broadcast %cst_11 : f32 to vector<8x512xf32>
    %15 = arith.maximumf %13, %14 : vector<8x512xf32>
    %16 = arith.truncf %15 : vector<8x512xf32> to vector<8x512xbf16>
    %c0_12 = arith.constant 0 : index
    %c0_13 = arith.constant 0 : index
    %17 = vector.load %arg5[%c0_12, %c0_13] : memref<512x768xbf16, #tpu.memory_space<vmem>>, vector<512x768xbf16>
    %cst_14 = arith.constant dense<0.000000e+00> : vector<8x768xf32>
    %18 = tpu.matmul %16, %17, %cst_14 {dimension_numbers = #tpu.dot_dimension_numbers<[1], [0], [0], [1], [0, 0, 1, 1], [], []>} : vector<8x512xbf16>, vector<512x768xbf16>, vector<8x768xf32> -> vector<8x768xf32>
    %c0_15 = arith.constant 0 : index
    %c0_16 = arith.constant 0 : index
    %19 = vector.load %arg6[%c0_15, %c0_16] : memref<1x768xf32, #tpu.memory_space<vmem>>, vector<1x768xf32>
    %20 = vector.broadcast %19 : vector<1x768xf32> to vector<8x768xf32>
    %21 = arith.addf %18, %20 : vector<8x768xf32>
    %22 = vector.extract_strided_slice %21 {offsets = [0, 0], sizes = [8, 128], strides = [1, 1]} : vector<8x768xf32> to vector<8x128xf32>
    %cst_17 = arith.constant dense<0xFF800000> : vector<8xf32>
    %23 = vector.multi_reduction <maximumf>, %22, %cst_17 [1] : vector<8x128xf32> to vector<8xf32>
    %24 = vector.shape_cast %23 : vector<8xf32> to vector<8x1xf32>
    %25 = vector.broadcast %24 : vector<8x1xf32> to vector<8x128xf32>
    %26 = arith.subf %22, %25 : vector<8x128xf32>
    %27 = math.exp %26 : vector<8x128xf32>
    %cst_18 = arith.constant dense<0.000000e+00> : vector<8xf32>
    %28 = vector.multi_reduction <add>, %27, %cst_18 [1] : vector<8x128xf32> to vector<8xf32>
    %29 = vector.shape_cast %28 : vector<8xf32> to vector<8x1xf32>
    %30 = vector.broadcast %29 : vector<8x1xf32> to vector<8x128xf32>
    %31 = arith.divf %27, %30 : vector<8x128xf32>
    %c0_19 = arith.constant 0 : index
    %c0_20 = arith.constant 0 : index
    %32 = vector.load %arg7[%c0_19, %c0_20] : memref<8x768xf32, #tpu.memory_space<vmem>>, vector<8x128xf32>
    tpu.vector_store %arg7[%c0_19, %c0_20], %31 {strides = array<i32>} : memref<8x768xf32, #tpu.memory_space<vmem>>, vector<8x128xf32>,
    %33 = vector.extract_strided_slice %21 {offsets = [0, 128], sizes = [8, 128], strides = [1, 1]} : vector<8x768xf32> to vector<8x128xf32>
    %cst_21 = arith.constant dense<0xFF800000> : vector<8xf32>
    %34 = vector.multi_reduction <maximumf>, %33, %cst_21 [1] : vector<8x128xf32> to vector<8xf32>
    %35 = vector.shape_cast %34 : vector<8xf32> to vector<8x1xf32>
    %36 = vector.broadcast %35 : vector<8x1xf32> to vector<8x128xf32>
    %37 = arith.subf %33, %36 : vector<8x128xf32>
    %38 = math.exp %37 : vector<8x128xf32>
    %cst_22 = arith.constant dense<0.000000e+00> : vector<8xf32>
    %39 = vector.multi_reduction <add>, %38, %cst_22 [1] : vector<8x128xf32> to vector<8xf32>
    %40 = vector.shape_cast %39 : vector<8xf32> to vector<8x1xf32>
    %41 = vector.broadcast %40 : vector<8x1xf32> to vector<8x128xf32>
    %42 = arith.divf %38, %41 : vector<8x128xf32>
    %c0_23 = arith.constant 0 : index
    %c128 = arith.constant 128 : index
    %43 = vector.load %arg7[%c0_23, %c128] : memref<8x768xf32, #tpu.memory_space<vmem>>, vector<8x128xf32>
    tpu.vector_store %arg7[%c0_23, %c128], %42 {strides = array<i32>} : memref<8x768xf32, #tpu.memory_space<vmem>>, vector<8x128xf32>,
    %44 = vector.extract_strided_slice %21 {offsets = [0, 256], sizes = [8, 128], strides = [1, 1]} : vector<8x768xf32> to vector<8x128xf32>
    %cst_24 = arith.constant dense<0xFF800000> : vector<8xf32>
    %45 = vector.multi_reduction <maximumf>, %44, %cst_24 [1] : vector<8x128xf32> to vector<8xf32>
    %46 = vector.shape_cast %45 : vector<8xf32> to vector<8x1xf32>
    %47 = vector.broadcast %46 : vector<8x1xf32> to vector<8x128xf32>
    %48 = arith.subf %44, %47 : vector<8x128xf32>
    %49 = math.exp %48 : vector<8x128xf32>
    %cst_25 = arith.constant dense<0.000000e+00> : vector<8xf32>
    %50 = vector.multi_reduction <add>, %49, %cst_25 [1] : vector<8x128xf32> to vector<8xf32>
    %51 = vector.shape_cast %50 : vector<8xf32> to vector<8x1xf32>
    %52 = vector.broadcast %51 : vector<8x1xf32> to vector<8x128xf32>
    %53 = arith.divf %49, %52 : vector<8x128xf32>
    %c0_26 = arith.constant 0 : index
    %c256 = arith.constant 256 : index
    %54 = vector.load %arg7[%c0_26, %c256] : memref<8x768xf32, #tpu.memory_space<vmem>>, vector<8x128xf32>
    tpu.vector_store %arg7[%c0_26, %c256], %53 {strides = array<i32>} : memref<8x768xf32, #tpu.memory_space<vmem>>, vector<8x128xf32>,
    %55 = vector.extract_strided_slice %21 {offsets = [0, 384], sizes = [8, 128], strides = [1, 1]} : vector<8x768xf32> to vector<8x128xf32>
    %cst_27 = arith.constant dense<0xFF800000> : vector<8xf32>
    %56 = vector.multi_reduction <maximumf>, %55, %cst_27 [1] : vector<8x128xf32> to vector<8xf32>
    %57 = vector.shape_cast %56 : vector<8xf32> to vector<8x1xf32>
    %58 = vector.broadcast %57 : vector<8x1xf32> to vector<8x128xf32>
    %59 = arith.subf %55, %58 : vector<8x128xf32>
    %60 = math.exp %59 : vector<8x128xf32>
    %cst_28 = arith.constant dense<0.000000e+00> : vector<8xf32>
    %61 = vector.multi_reduction <add>, %60, %cst_28 [1] : vector<8x128xf32> to vector<8xf32>
    %62 = vector.shape_cast %61 : vector<8xf32> to vector<8x1xf32>
    %63 = vector.broadcast %62 : vector<8x1xf32> to vector<8x128xf32>
    %64 = arith.divf %60, %63 : vector<8x128xf32>
    %c0_29 = arith.constant 0 : index
    %c384 = arith.constant 384 : index
    %65 = vector.load %arg7[%c0_29, %c384] : memref<8x768xf32, #tpu.memory_space<vmem>>, vector<8x128xf32>
    tpu.vector_store %arg7[%c0_29, %c384], %64 {strides = array<i32>} : memref<8x768xf32, #tpu.memory_space<vmem>>, vector<8x128xf32>,
    %66 = vector.extract_strided_slice %21 {offsets = [0, 512], sizes = [8, 128], strides = [1, 1]} : vector<8x768xf32> to vector<8x128xf32>
    %cst_30 = arith.constant dense<0xFF800000> : vector<8xf32>
    %67 = vector.multi_reduction <maximumf>, %66, %cst_30 [1] : vector<8x128xf32> to vector<8xf32>
    %68 = vector.shape_cast %67 : vector<8xf32> to vector<8x1xf32>
    %69 = vector.broadcast %68 : vector<8x1xf32> to vector<8x128xf32>
    %70 = arith.subf %66, %69 : vector<8x128xf32>
    %71 = math.exp %70 : vector<8x128xf32>
    %cst_31 = arith.constant dense<0.000000e+00> : vector<8xf32>
    %72 = vector.multi_reduction <add>, %71, %cst_31 [1] : vector<8x128xf32> to vector<8xf32>
    %73 = vector.shape_cast %72 : vector<8xf32> to vector<8x1xf32>
    %74 = vector.broadcast %73 : vector<8x1xf32> to vector<8x128xf32>
    %75 = arith.divf %71, %74 : vector<8x128xf32>
    %c0_32 = arith.constant 0 : index
    %c512 = arith.constant 512 : index
    %76 = vector.load %arg7[%c0_32, %c512] : memref<8x768xf32, #tpu.memory_space<vmem>>, vector<8x128xf32>
    tpu.vector_store %arg7[%c0_32, %c512], %75 {strides = array<i32>} : memref<8x768xf32, #tpu.memory_space<vmem>>, vector<8x128xf32>,
    %77 = vector.extract_strided_slice %21 {offsets = [0, 640], sizes = [8, 128], strides = [1, 1]} : vector<8x768xf32> to vector<8x128xf32>
    %cst_33 = arith.constant dense<0xFF800000> : vector<8xf32>
    %78 = vector.multi_reduction <maximumf>, %77, %cst_33 [1] : vector<8x128xf32> to vector<8xf32>
    %79 = vector.shape_cast %78 : vector<8xf32> to vector<8x1xf32>
    %80 = vector.broadcast %79 : vector<8x1xf32> to vector<8x128xf32>
    %81 = arith.subf %77, %80 : vector<8x128xf32>
    %82 = math.exp %81 : vector<8x128xf32>
    %cst_34 = arith.constant dense<0.000000e+00> : vector<8xf32>
    %83 = vector.multi_reduction <add>, %82, %cst_34 [1] : vector<8x128xf32> to vector<8xf32>
    %84 = vector.shape_cast %83 : vector<8xf32> to vector<8x1xf32>
    %85 = vector.broadcast %84 : vector<8x1xf32> to vector<8x128xf32>
    %86 = arith.divf %82, %85 : vector<8x128xf32>
    %c0_35 = arith.constant 0 : index
    %c640 = arith.constant 640 : index
    %87 = vector.load %arg7[%c0_35, %c640] : memref<8x768xf32, #tpu.memory_space<vmem>>, vector<8x128xf32>
    tpu.vector_store %arg7[%c0_35, %c640], %86 {strides = array<i32>} : memref<8x768xf32, #tpu.memory_space<vmem>>, vector<8x128xf32>,
    return
  }
}

</mosaic_0001>

<bundles_post_ra>
// kernel: c51_forward.3
= control target key start
LH: loop header
LB: loop body
LE: loop exit
PB: predicated region body
PF: predicated region fallthrough
CT: control target
= control target key end

     0   :  { %vm423_vm0 = vcmask 257024   ;;  %s830_s1 = inlined_call_operand.vmem [shape: bf16[256,32], index: 1, kind: input, shape index: {}]   ;;  %s831_s0 = inlined_call_operand.vmem [shape: bf16[128,256], index: 0, kind: input, shape index: {}]   ;;  %s832_s2 = inlined_call_operand.vmem [shape: f32[1,32], index: 2, kind: input, shape index: {}]   ;;  %s833_s3 = inlined_call_operand.vmem [shape: bf16[128,32], index: 3, kind: output, shape index: {}]  }
   0x1   :  { %v589_v0 = vld [vmem:[%s830_s1 + $0x78] sm:$0xff]   ;;  %v591_v2 = vld [vmem:[%s830_s1 + $0x70] sm:$0xff]   ;;  %v593_v4 = vld [vmem:[%s830_s1 + $0x68] sm:$0xff]  }
   0x2   :  { %v590_v1 = vld [vmem:[%s830_s1 + $0x38] sm:$0xff]   ;;  %509 = vmatprep.subr.bf16.mxu0 %v589_v0  ;;  %573 = vmatprep.subr.bf16.mxu1 %v589_v0  ;;  %v592_v3 = vld [vmem:[%s830_s1 + $0x30] sm:$0xff]   ;;  %v594_v5 = vld [vmem:[%s830_s1 + $0x28] sm:$0xff]  }
   0x3   :  { %510 = vmatpush3.bf16.msra.mxu0 %v590_v1  ;;  %581 = vmatpush3.bf16.msra.mxu1 %v590_v1  ;;  %v595_v6 = vld [vmem:[%s830_s1 + $0x60] sm:$0xff]   ;;  %v597_v8 = vld [vmem:[%s830_s1 + $0x58] sm:$0xff]   ;;  %v599_v10 = vld [vmem:[%s830_s1 + $0x50] sm:$0xff]  }
   0x4   :  { %511 = vmatprep.subr.bf16.mxu0 %v591_v2  ;;  %574 = vmatprep.subr.bf16.mxu1 %v591_v2  ;;  %v596_v7 = vld [vmem:[%s830_s1 + $0x20] sm:$0xff]   ;;  %v598_v9 = vld [vmem:[%s830_s1 + $0x18] sm:$0xff]   ;;  %v600_v13 = vld [vmem:[%s830_s1 + $0x10] sm:$0xff]  }
   0x5   :  { %v607_v11 = vld [vmem:[%s831_s0 + $0x4] ss:$8 sps:$4 sm:$0xff]   ;;  %v605_v18 = vld [vmem:[%s831_s0] ss:$8 sps:$4 sm:$0xff]   ;;  %v611_v20 = vld [vmem:[%s831_s0 + $0x14] ss:$8 sps:$4 sm:$0xff]  }
   0x6   :  { %v610_v12 = vld [vmem:[%s831_s0 + $0x44] ss:$8 sps:$4 sm:$0xff]   ;;  %278 = vmatprep.mubr.bf16.mxu0 %v607_v11  ;;  %v608_v19 = vld [vmem:[%s831_s0 + $0x40] ss:$8 sps:$4 sm:$0xff]   ;;  %v613_v21 = vld [vmem:[%s831_s0 + $0x54] ss:$8 sps:$4 sm:$0xff]  }
   0x7   :  { %512 = vmatpush3.bf16.msra.mxu0 %v592_v3  ;;  %582 = vmatpush3.bf16.msra.mxu1 %v592_v3  ;;  %v601_v14 = vld [vmem:[%s830_s1 + $0x48] sm:$0xff]   ;;  %v603_v16 = vld [vmem:[%s830_s1 + $0x40] sm:$0xff]   ;;  %v615_v22 = vld [vmem:[%s831_s0 + $0x10] ss:$8 sps:$4 sm:$0xff]  }
   0x8   :  { %513 = vmatprep.subr.bf16.mxu0 %v593_v4  ;;  %575 = vmatprep.subr.bf16.mxu1 %v593_v4  ;;  %v602_v15 = vld [vmem:[%s830_s1 + $0x8] sm:$0xff]   ;;  %v604_v17 = vld [vmem:[%s830_s1] sm:$0xff]   ;;  %v616_v23 = vld [vmem:[%s831_s0 + $0x50] ss:$8 sps:$4 sm:$0xff]  }
   0x9   :  { %310 = vmatprep.mubr.bf16.mxu1 %v610_v12  ;;  %v617_v24 = vld [vmem:[%s831_s0 + $0x24] ss:$8 sps:$4 sm:$0xff]   ;;  %v621_v26 = vld [vmem:[%s831_s0 + $0x20] ss:$8 sps:$4 sm:$0xff]   ;;  %v623_v28 = vld [vmem:[%s831_s0 + $0x34] ss:$8 sps:$4 sm:$0xff]  }
   0xa   :  { %v619_v25 = vld [vmem:[%s831_s0 + $0x64] ss:$8 sps:$4 sm:$0xff]   ;;  %v622_v27 = vld [vmem:[%s831_s0 + $0x60] ss:$8 sps:$4 sm:$0xff]   ;;  %v625_v29 = vld [vmem:[%s831_s0 + $0x74] ss:$8 sps:$4 sm:$0xff]  }
   0xb   :  { %514 = vmatpush3.bf16.msra.mxu0 %v594_v5  ;;  %583 = vmatpush3.bf16.msra.mxu1 %v594_v5  ;;  %v627_v30 = vld [vmem:[%s831_s0 + $0x30] ss:$8 sps:$4 sm:$0xff]   ;;  %v748_v34 = vld [vmem:[%s832_s2] ss:$0 sm:$0xff] }
   0xc   :  { %515 = vmatprep.subr.bf16.mxu0 %v595_v6  ;;  %576 = vmatprep.subr.bf16.mxu1 %v595_v6  ;;  %v628_v31 = vld [vmem:[%s831_s0 + $0x70] ss:$8 sps:$4 sm:$0xff]  }
   0xf   :  { %516 = vmatpush3.bf16.msra.mxu0 %v596_v7  ;;  %584 = vmatpush3.bf16.msra.mxu1 %v596_v7 }
  0x10   :  { %517 = vmatprep.subr.bf16.mxu0 %v597_v8  ;;  %577 = vmatprep.subr.bf16.mxu1 %v597_v8 }
  0x13   :  { %518 = vmatpush3.bf16.msra.mxu0 %v598_v9  ;;  %585 = vmatpush3.bf16.msra.mxu1 %v598_v9 }
  0x14   :  { %519 = vmatprep.subr.bf16.mxu0 %v599_v10  ;;  %578 = vmatprep.subr.bf16.mxu1 %v599_v10 }
  0x17   :  { %520 = vmatpush3.bf16.msra.mxu0 %v600_v13  ;;  %586 = vmatpush3.bf16.msra.mxu1 %v600_v13 }
  0x18   :  { %521 = vmatprep.subr.bf16.mxu0 %v601_v14  ;;  %579 = vmatprep.subr.bf16.mxu1 %v601_v14 }
  0x1b   :  { %522 = vmatpush3.bf16.msra.mxu0 %v602_v15  ;;  %587 = vmatpush3.bf16.msra.mxu1 %v602_v15 }
  0x1c   :  { %523 = vmatprep.subr.bf16.mxu0 %v603_v16  ;;  %580 = vmatprep.subr.bf16.mxu1 %v603_v16 }
  0x1f   :  { %524 = vmatpush3.bf16.msra.mxu0 %v604_v17  ;;  %588 = vmatpush3.bf16.msra.mxu1 %v604_v17 }
  0x22   :  { %279 = vmatmul.mubr.bf16.vlgmr.msra.gmra.mxu0 %v605_v18  ;;  %311 = vmatmul.mubr.bf16.vlgmr.msra.gmra.mxu1 %v608_v19 }
  0x23   :  { %286 = vmatprep.mubr.bf16.mxu0 %v611_v20  ;;  %318 = vmatprep.mubr.bf16.mxu1 %v613_v21 }
  0x2a   :  { %287 = vmatmul.mubr.bf16.gmra.mxu0 %v615_v22  ;;  %319 = vmatmul.mubr.bf16.gmra.mxu1 %v616_v23 }
  0x2b   :  { %294 = vmatprep.mubr.bf16.mxu0 %v617_v24  ;;  %326 = vmatprep.mubr.bf16.mxu1 %v619_v25 }
  0x32   :  { %295 = vmatmul.mubr.bf16.gmra.mxu0 %v621_v26  ;;  %327 = vmatmul.mubr.bf16.gmra.mxu1 %v622_v27 }
  0x33   :  { %302 = vmatprep.mubr.bf16.mxu0 %v623_v28  ;;  %334 = vmatprep.mubr.bf16.mxu1 %v625_v29 }
  0x3a   :  { %303 = vmatmul.mubr.bf16.gmra.mxu0 %v627_v30  ;;  %335 = vmatmul.mubr.bf16.gmra.mxu1 %v628_v31 }
  0xe2   :  { %v525_v32 = vpop.f32.mrf.mxu0  ;;  %v549_v33 = vpop.f32.mrf.mxu1 }
  0xe4   :  { %v526_v35 = vpop.f32.mrf.mxu0  ;;  %v550_v36 = vpop.f32.mrf.mxu1 }
  0xe5   :  { %v527_v37 = vadd.f32 %v526_v35, %v525_v32  ;;  %v551_v38 = vadd.f32 %v550_v36, %v549_v33 }
  0xe6   :  { %v528_v39 = vpop.f32.mrf.mxu0  ;;  %v552_v40 = vpop.f32.mrf.mxu1 }
  0xe7   :  { %v281_v41 = vadd.f32 %v527_v37, %v748_v34  ;;  %v313_v42 = vadd.f32 %v551_v38, %v748_v34 }
  0xe8   :  { %v529_v43 = vpop.f32.mrf.mxu0  ;;  %v553_v44 = vpop.f32.mrf.mxu1 }
  0xe9   :  { %v343_v45 = vmax.f32 %v281_v41, 0.0  ;;  %v351_v46 = vmax.f32 %v313_v42, 0.0  ;;  %v530_v47 = vadd.f32 %v529_v43, %v528_v39  ;;  %v554_v48 = vadd.f32 %v553_v44, %v552_v40 }
  0xea   :  { %v531_v49 = vpop.f32.mrf.mxu0  ;;  %v555_v50 = vpop.f32.mrf.mxu1 }
  0xeb   :  { %v493_v51 = vpack.c.bf16 %v343_v45, %v343_v45  ;;  %v501_v52 = vpack.c.bf16 %v351_v46, %v351_v46  ;;  %v284_v53 = vadd.f32 %v530_v47, %v748_v34  ;;  %v316_v54 = vadd.f32 %v554_v48, %v748_v34 }
  0xec   :  { %v532_v55 = vpop.f32.mrf.mxu0  ;;  %v556_v56 = vpop.f32.mrf.mxu1 }
  0xed   :  { %424 = vst.msk [vmem:[%s833_s3] sm:$0xf] %vm423_vm0, %v493_v51  ;;  %432 = vst.msk [vmem:[%s833_s3 + $0x20] sm:$0xf] %vm423_vm0, %v501_v52  ;;  %v344_v57 = vmax.f32 %v284_v53, 0.0  ;;  %v352_v58 = vmax.f32 %v316_v54, 0.0  ;;  %v533_v59 = vadd.f32 %v532_v55, %v531_v49  ;;  %v557_v60 = vadd.f32 %v556_v56, %v555_v50 }
  0xee   :  { %v534_v61 = vpop.f32.mrf.mxu0  ;;  %v558_v62 = vpop.f32.mrf.mxu1 }
  0xef   :  { %v494_v63 = vpack.c.bf16 %v344_v57, %v344_v57  ;;  %v502_v0 = vpack.c.bf16 %v352_v58, %v352_v58  ;;  %v289_v1 = vadd.f32 %v533_v59, %v748_v34  ;;  %v321_v2 = vadd.f32 %v557_v60, %v748_v34 }
  0xf0   :  { %v535_v3 = vpop.f32.mrf.mxu0  ;;  %v559_v4 = vpop.f32.mrf.mxu1 }
  0xf1   :  { %425 = vst.msk [vmem:[%s833_s3 + $0x4] sm:$0xf] %vm423_vm0, %v494_v63  ;;  %433 = vst.msk [vmem:[%s833_s3 + $0x24] sm:$0xf] %vm423_vm0, %v502_v0  ;;  %v345_v5 = vmax.f32 %v289_v1, 0.0  ;;  %v353_v6 = vmax.f32 %v321_v2, 0.0  ;;  %v536_v7 = vadd.f32 %v535_v3, %v534_v61  ;;  %v560_v8 = vadd.f32 %v559_v4, %v558_v62 }
  0xf2   :  { %v537_v9 = vpop.f32.mrf.mxu0  ;;  %v561_v10 = vpop.f32.mrf.mxu1 }
  0xf3   :  { %v495_v11 = vpack.c.bf16 %v345_v5, %v345_v5  ;;  %v503_v12 = vpack.c.bf16 %v353_v6, %v353_v6  ;;  %v292_v13 = vadd.f32 %v536_v7, %v748_v34  ;;  %v324_v14 = vadd.f32 %v560_v8, %v748_v34 }
  0xf4   :  { %v538_v15 = vpop.f32.mrf.mxu0  ;;  %v562_v16 = vpop.f32.mrf.mxu1 }
  0xf5   :  { %426 = vst.msk [vmem:[%s833_s3 + $0x8] sm:$0xf] %vm423_vm0, %v495_v11  ;;  %434 = vst.msk [vmem:[%s833_s3 + $0x28] sm:$0xf] %vm423_vm0, %v503_v12  ;;  %v346_v17 = vmax.f32 %v292_v13, 0.0  ;;  %v354_v18 = vmax.f32 %v324_v14, 0.0  ;;  %v539_v19 = vadd.f32 %v538_v15, %v537_v9  ;;  %v563_v20 = vadd.f32 %v562_v16, %v561_v10 }
  0xf6   :  { %v540_v21 = vpop.f32.mrf.mxu0  ;;  %v564_v22 = vpop.f32.mrf.mxu1 }
  0xf7   :  { %v496_v23 = vpack.c.bf16 %v346_v17, %v346_v17  ;;  %v504_v24 = vpack.c.bf16 %v354_v18, %v354_v18  ;;  %v297_v25 = vadd.f32 %v539_v19, %v748_v34  ;;  %v329_v26 = vadd.f32 %v563_v20, %v748_v34 }
  0xf8   :  { %v541_v27 = vpop.f32.mrf.mxu0  ;;  %v565_v28 = vpop.f32.mrf.mxu1 }
  0xf9   :  { %427 = vst.msk [vmem:[%s833_s3 + $0xc] sm:$0xf] %vm423_vm0, %v496_v23  ;;  %435 = vst.msk [vmem:[%s833_s3 + $0x2c] sm:$0xf] %vm423_vm0, %v504_v24  ;;  %v347_v29 = vmax.f32 %v297_v25, 0.0  ;;  %v355_v30 = vmax.f32 %v329_v26, 0.0  ;;  %v542_v31 = vadd.f32 %v541_v27, %v540_v21  ;;  %v566_v32 = vadd.f32 %v565_v28, %v564_v22 }
  0xfa   :  { %v543_v33 = vpop.f32.mrf.mxu0  ;;  %v567_v35 = vpop.f32.mrf.mxu1 }
  0xfb   :  { %v497_v36 = vpack.c.bf16 %v347_v29, %v347_v29  ;;  %v505_v37 = vpack.c.bf16 %v355_v30, %v355_v30  ;;  %v300_v38 = vadd.f32 %v542_v31, %v748_v34  ;;  %v332_v39 = vadd.f32 %v566_v32, %v748_v34 }
  0xfc   :  { %v544_v40 = vpop.f32.mrf.mxu0  ;;  %v568_v41 = vpop.f32.mrf.mxu1 }
  0xfd   :  { %428 = vst.msk [vmem:[%s833_s3 + $0x10] sm:$0xf] %vm423_vm0, %v497_v36  ;;  %436 = vst.msk [vmem:[%s833_s3 + $0x30] sm:$0xf] %vm423_vm0, %v505_v37  ;;  %v348_v42 = vmax.f32 %v300_v38, 0.0  ;;  %v356_v43 = vmax.f32 %v332_v39, 0.0  ;;  %v545_v44 = vadd.f32 %v544_v40, %v543_v33  ;;  %v569_v45 = vadd.f32 %v568_v41, %v567_v35 }
  0xfe   :  { %v546_v46 = vpop.f32.mrf.mxu0  ;;  %v570_v47 = vpop.f32.mrf.mxu1 }
  0xff   :  { %v498_v48 = vpack.c.bf16 %v348_v42, %v348_v42  ;;  %v506_v49 = vpack.c.bf16 %v356_v43, %v356_v43  ;;  %v305_v50 = vadd.f32 %v545_v44, %v748_v34  ;;  %v337_v51 = vadd.f32 %v569_v45, %v748_v34 }
 0x100   :  { %v547_v52 = vpop.f32.mrf.mxu0  ;;  %v571_v53 = vpop.f32.mrf.mxu1 }
 0x101   :  { %429 = vst.msk [vmem:[%s833_s3 + $0x14] sm:$0xf] %vm423_vm0, %v498_v48  ;;  %437 = vst.msk [vmem:[%s833_s3 + $0x34] sm:$0xf] %vm423_vm0, %v506_v49  ;;  %v349_v54 = vmax.f32 %v305_v50, 0.0  ;;  %v357_v55 = vmax.f32 %v337_v51, 0.0  ;;  %v548_v56 = vadd.f32 %v547_v52, %v546_v46  ;;  %v572_v57 = vadd.f32 %v571_v53, %v570_v47 }
 0x103   :  { %v499_v58 = vpack.c.bf16 %v349_v54, %v349_v54  ;;  %v507_v59 = vpack.c.bf16 %v357_v55, %v357_v55  ;;  %v308_v60 = vadd.f32 %v548_v56, %v748_v34  ;;  %v340_v61 = vadd.f32 %v572_v57, %v748_v34 }
 0x105   :  { %430 = vst.msk [vmem:[%s833_s3 + $0x18] sm:$0xf] %vm423_vm0, %v499_v58  ;;  %438 = vst.msk [vmem:[%s833_s3 + $0x38] sm:$0xf] %vm423_vm0, %v507_v59  ;;  %v350_v62 = vmax.f32 %v308_v60, 0.0  ;;  %v358_v63 = vmax.f32 %v340_v61, 0.0 }
 0x107   :  { %v500_v0 = vpack.c.bf16 %v350_v62, %v350_v62  ;;  %v508_v1 = vpack.c.bf16 %v358_v63, %v358_v63 }
 0x109   :  { %431 = vst.msk [vmem:[%s833_s3 + $0x1c] sm:$0xf] %vm423_vm0, %v500_v0  ;;  %439 = vst.msk [vmem:[%s833_s3 + $0x3c] sm:$0xf] %vm423_vm0, %v508_v1 }

// kernel: c51_forward.4
= control target key start
LH: loop header
LB: loop body
LE: loop exit
PB: predicated region body
PF: predicated region fallthrough
CT: control target
= control target key end

     0   :  { %vm430_vm0 = vcmask 519168   ;;  %s732_s1 = inlined_call_operand.vmem [shape: bf16[512,64], index: 1, kind: input, shape index: {}]   ;;  %s733_s0 = inlined_call_operand.vmem [shape: bf16[24,512], index: 0, kind: input, shape index: {}]   ;;  %s734_s2 = inlined_call_operand.vmem [shape: f32[1,64], index: 2, kind: input, shape index: {}]   ;;  %s735_s3 = inlined_call_operand.vmem [shape: bf16[24,64], index: 3, kind: output, shape index: {}]  }
   0x1   :  { %v541_v0 = vld [vmem:[%s732_s1 + $0x78] sm:$0xff]   ;;  %v545_v4 = vld [vmem:[%s732_s1 + $0x70] sm:$0xff]   ;;  %v549_v8 = vld [vmem:[%s732_s1 + $0x68] sm:$0xff]  }
   0x2   :  { %v542_v1 = vld [vmem:[%s732_s1 + $0xf8] sm:$0xff]   ;;  %485 = vmatprep.subr.bf16.mxu0 %v541_v0  ;;  %v546_v5 = vld [vmem:[%s732_s1 + $0xf0] sm:$0xff]   ;;  %v550_v9 = vld [vmem:[%s732_s1 + $0xe8] sm:$0xff]  }
   0x3   :  { %v543_v2 = vld [vmem:[%s732_s1 + $0x38] sm:$0xff]   ;;  %513 = vmatprep.subr.bf16.mxu1 %v542_v1  ;;  %v547_v6 = vld [vmem:[%s732_s1 + $0x30] sm:$0xff]   ;;  %v551_v10 = vld [vmem:[%s732_s1 + $0x28] sm:$0xff]  }
   0x4   :  { %v544_v3 = vld [vmem:[%s732_s1 + $0xb8] sm:$0xff]   ;;  %486 = vmatpush3.bf16.msra.mxu0 %v543_v2  ;;  %v548_v7 = vld [vmem:[%s732_s1 + $0xb0] sm:$0xff]   ;;  %v552_v11 = vld [vmem:[%s732_s1 + $0xa8] sm:$0xff]  }
   0x5   :  { %514 = vmatpush3.bf16.msra.mxu1 %v544_v3  ;;  %487 = vmatprep.subr.bf16.mxu0 %v545_v4  ;;  %v553_v12 = vld [vmem:[%s732_s1 + $0x60] sm:$0xff]   ;;  %v557_v16 = vld [vmem:[%s732_s1 + $0x58] sm:$0xff]   ;;  %v561_v20 = vld [vmem:[%s732_s1 + $0x50] sm:$0xff]  }
   0x6   :  { %515 = vmatprep.subr.bf16.mxu1 %v546_v5  ;;  %v554_v13 = vld [vmem:[%s732_s1 + $0xe0] sm:$0xff]   ;;  %v558_v17 = vld [vmem:[%s732_s1 + $0xd8] sm:$0xff]   ;;  %v562_v21 = vld [vmem:[%s732_s1 + $0xd0] sm:$0xff]  }
   0x7   :  { %v555_v14 = vld [vmem:[%s732_s1 + $0x20] sm:$0xff]   ;;  %v559_v18 = vld [vmem:[%s732_s1 + $0x18] sm:$0xff]   ;;  %v563_v22 = vld [vmem:[%s732_s1 + $0x10] sm:$0xff]  }
   0x8   :  { %488 = vmatpush3.bf16.msra.mxu0 %v547_v6  ;;  %v556_v15 = vld [vmem:[%s732_s1 + $0xa0] sm:$0xff]   ;;  %v560_v19 = vld [vmem:[%s732_s1 + $0x98] sm:$0xff]   ;;  %v564_v23 = vld [vmem:[%s732_s1 + $0x90] sm:$0xff]  }
   0x9   :  { %516 = vmatpush3.bf16.msra.mxu1 %v548_v7  ;;  %489 = vmatprep.subr.bf16.mxu0 %v549_v8  ;;  %v565_v24 = vld [vmem:[%s732_s1 + $0x48] sm:$0xff]   ;;  %v569_v28 = vld [vmem:[%s732_s1 + $0x40] sm:$0xff]  }
   0xa   :  { %517 = vmatprep.subr.bf16.mxu1 %v550_v9  ;;  %v566_v25 = vld [vmem:[%s732_s1 + $0xc8] sm:$0xff]   ;;  %v570_v29 = vld [vmem:[%s732_s1 + $0xc0] sm:$0xff]  }
   0xb   :  { %v567_v26 = vld [vmem:[%s732_s1 + $0x8] sm:$0xff]   ;;  %v571_v30 = vld [vmem:[%s732_s1] sm:$0xff]  }
   0xc   :  { %490 = vmatpush3.bf16.msra.mxu0 %v551_v10  ;;  %v568_v27 = vld [vmem:[%s732_s1 + $0x88] sm:$0xff]   ;;  %v572_v31 = vld [vmem:[%s732_s1 + $0x80] sm:$0xff]  }
   0xd   :  { %518 = vmatpush3.bf16.msra.mxu1 %v552_v11  ;;  %491 = vmatprep.subr.bf16.mxu0 %v553_v12  ;;  %v573_v32 = vld [vmem:[%s733_s0] ss:$16 sps:$4 sm:$0xff]   ;;  %v575_v33 = vld [vmem:[%s733_s0 + $0x4] ss:$16 sps:$4 sm:$0xff]   ;;  %v576_v34 = vld [vmem:[%s733_s0 + $0x8] ss:$16 sps:$4 sm:$0xff]  }
   0xe   :  { %519 = vmatprep.subr.bf16.mxu1 %v554_v13  ;;  %v578_v35 = vld [vmem:[%s733_s0 + $0xc] ss:$16 sps:$4 sm:$0xff]   ;;  %v19_v36 = vld [vmem:[%s733_s0 + $0x20] sm:$0xff]  ;;  %350 = vmatprep.mubr.bf16.mxu0 %v575_v33 }
   0xf   :  { %v444_v37 = vcombine.high %v19_v36, %v19_v36  ;;  %v20_v38 = vld [vmem:[%s733_s0 + $0x28] sm:$0xff]  ;;  %398 = vmatprep.mubr.bf16.mxu1 %v578_v35  ;;  %v443_v40 = vcombine.low %v19_v36, %v19_v36  ;;  %v438_v44 = vld [vmem:[%s734_s2] ss:$0 sm:$0xff] }
  0x10   :  { %492 = vmatpush3.bf16.msra.mxu0 %v555_v14  ;;  %v446_v39 = vcombine.high %v20_v38, %v20_v38  ;;  %v445_v41 = vcombine.low %v20_v38, %v20_v38 }
  0x11   :  { %520 = vmatpush3.bf16.msra.mxu1 %v556_v15  ;;  %493 = vmatprep.subr.bf16.mxu0 %v557_v16 }
  0x12   :  { %521 = vmatprep.subr.bf16.mxu1 %v558_v17 }
  0x14   :  { %494 = vmatpush3.bf16.msra.mxu0 %v559_v18 }
  0x15   :  { %522 = vmatpush3.bf16.msra.mxu1 %v560_v19  ;;  %495 = vmatprep.subr.bf16.mxu0 %v561_v20 }
  0x16   :  { %523 = vmatprep.subr.bf16.mxu1 %v562_v21 }
  0x18   :  { %496 = vmatpush3.bf16.msra.mxu0 %v563_v22 }
  0x19   :  { %524 = vmatpush3.bf16.msra.mxu1 %v564_v23  ;;  %497 = vmatprep.subr.bf16.mxu0 %v565_v24 }
  0x1a   :  { %525 = vmatprep.subr.bf16.mxu1 %v566_v25 }
  0x1c   :  { %498 = vmatpush3.bf16.msra.mxu0 %v567_v26 }
  0x1d   :  { %526 = vmatpush3.bf16.msra.mxu1 %v568_v27  ;;  %499 = vmatprep.subr.bf16.mxu0 %v569_v28 }
  0x1e   :  { %527 = vmatprep.subr.bf16.mxu1 %v570_v29 }
  0x20   :  { %500 = vmatpush3.bf16.msra.mxu0 %v571_v30 }
  0x21   :  { %528 = vmatpush3.bf16.msra.mxu1 %v572_v31 }
  0x23   :  { %351 = vmatmul.mubr.bf16.vlgmr.msra.gmra.mxu0 %v573_v32 }
  0x24   :  { %399 = vmatmul.mubr.bf16.vlgmr.msra.gmra.mxu1 %v576_v34  ;;  %358 = vmatprep.mubr.bf16.mxu0 %v444_v37 }
  0x25   :  { %406 = vmatprep.mubr.bf16.mxu1 %v446_v39 }
  0x2b   :  { %359 = vmatmul.mubr.bf16.gmra.mxu0 %v443_v40 }
  0x2c   :  { %407 = vmatmul.mubr.bf16.gmra.mxu1 %v445_v41 }
  0xe3   :  { %v501_v42 = vpop.f32.mrf.mxu0 }
  0xe4   :  { %v529_v43 = vpop.f32.mrf.mxu1 }
  0xe5   :  { %v502_v45 = vpop.f32.mrf.mxu0 }
  0xe6   :  { %v503_v46 = vadd.f32 %v502_v45, %v501_v42  ;;  %v530_v47 = vpop.f32.mrf.mxu1 }
  0xe7   :  { %v504_v48 = vpop.f32.mrf.mxu0  ;;  %v531_v50 = vadd.f32 %v530_v47, %v529_v43 }
  0xe8   :  { %v353_v49 = vadd.f32 %v503_v46, %v438_v44  ;;  %v532_v51 = vpop.f32.mrf.mxu1 }
  0xe9   :  { %v505_v52 = vpop.f32.mrf.mxu0 }
  0xea   :  { %v401_v53 = vadd.f32 %v531_v50, %v353_v49  ;;  %v506_v54 = vadd.f32 %v505_v52, %v504_v48  ;;  %v533_v55 = vpop.f32.mrf.mxu1 }
  0xeb   :  { %v507_v56 = vpop.f32.mrf.mxu0  ;;  %v534_v59 = vadd.f32 %v533_v55, %v532_v51 }
  0xec   :  { %v414_v57 = vmax.f32 %v401_v53, 0.0  ;;  %v356_v58 = vadd.f32 %v506_v54, %v438_v44  ;;  %v535_v60 = vpop.f32.mrf.mxu1 }
  0xed   :  { %v508_v61 = vpop.f32.mrf.mxu0 }
  0xee   :  { %v482_v62 = vpack.c.bf16 %v414_v57, %v414_v57  ;;  %v404_v63 = vadd.f32 %v534_v59, %v356_v58  ;;  %v509_v0 = vadd.f32 %v508_v61, %v507_v56  ;;  %v536_v1 = vpop.f32.mrf.mxu1 }
  0xef   :  { %v510_v2 = vpop.f32.mrf.mxu0  ;;  %v537_v5 = vadd.f32 %v536_v1, %v535_v60 }
  0xf0   :  { %431 = vst.msk [vmem:[%s735_s3] sm:$0xf] %vm430_vm0, %v482_v62  ;;  %v415_v3 = vmax.f32 %v404_v63, 0.0  ;;  %v361_v4 = vadd.f32 %v509_v0, %v438_v44  ;;  %v538_v6 = vpop.f32.mrf.mxu1 }
  0xf1   :  { %v511_v7 = vpop.f32.mrf.mxu0 }
  0xf2   :  { %v483_v8 = vpack.c.bf16 %v415_v3, %v415_v3  ;;  %v409_v9 = vadd.f32 %v537_v5, %v361_v4  ;;  %v539_v10 = vpop.f32.mrf.mxu1 }
  0xf4   :  { %432 = vst.msk [vmem:[%s735_s3 + $0x4] sm:$0xf] %vm430_vm0, %v483_v8  ;;  %v416_v11 = vmax.f32 %v409_v9, 0.0 }
  0xf6   :  { %v484_v12 = vpack.c.bf16 %v416_v11, %v416_v11 }
  0xf8   :  { %433 = vst.msk [vmem:[%s735_s3 + $0x8] sm:$0xf] %vm430_vm0, %v484_v12 }

// kernel: c51_forward.5
= control target key start
LH: loop header
LB: loop body
LE: loop exit
PB: predicated region body
PF: predicated region fallthrough
CT: control target
= control target key end

     0   :  { %v2867_v35 = vmov 0.0   ;;  %vm2868_vm0 = vmmov 0   ;;  %vm342_vm1 = vcmask 523264   ;;  %v2869_v60 = vmov 0   ;;  %s3725_s1 = inlined_call_operand.vmem [shape: bf16[576,64], index: 1, kind: input, shape index: {}]   ;;  %s3726_s0 = inlined_call_operand.vmem [shape: bf16[8,576], index: 0, kind: input, shape index: {}]   ;;  %s3727_s3 = inlined_call_operand.vmem [shape: bf16[64,512], index: 3, kind: input, shape index: {}]   ;;  %s3728_s5 = inlined_call_operand.vmem [shape: bf16[512,768], index: 5, kind: input, shape index: {}]   ;;  %s3729_s2 = inlined_call_operand.vmem [shape: f32[1,64], index: 2, kind: input, shape index: {}]   ;;  %s3730_s4 = inlined_call_operand.vmem [shape: f32[1,512], index: 4, kind: input, shape index: {}]   ;;  %s3731_s6 = inlined_call_operand.vmem [shape: f32[1,768], index: 6, kind: input, shape index: {}]   ;;  %s3732_s7 = inlined_call_operand.vmem [shape: f32[8,768], index: 7, kind: output, shape index: {}]  }
   0x1   :  { %v2490_v0 = vld [vmem:[%s3725_s1 + $0x78] sm:$0xff]   ;;  %v2494_v4 = vld [vmem:[%s3725_s1 + $0x70] sm:$0xff]   ;;  %v2498_v8 = vld [vmem:[%s3725_s1 + $0x68] sm:$0xff]  }
   0x2   :  { %v2491_v1 = vld [vmem:[%s3725_s1 + $0x38] sm:$0xff]   ;;  %2426 = vmatprep.subr.bf16.mxu0 %v2490_v0  ;;  %v2495_v5 = vld [vmem:[%s3725_s1 + $0x30] sm:$0xff]   ;;  %v2499_v9 = vld [vmem:[%s3725_s1 + $0x28] sm:$0xff]  }
   0x3   :  { %v2492_v2 = vld [vmem:[%s3725_s1 + $0xf8] sm:$0xff]   ;;  %2427 = vmatpush3.bf16.msra.mxu0 %v2491_v1  ;;  %v2496_v6 = vld [vmem:[%s3725_s1 + $0xf0] sm:$0xff]   ;;  %v2500_v10 = vld [vmem:[%s3725_s1 + $0xe8] sm:$0xff]  }
   0x4   :  { %v2493_v3 = vld [vmem:[%s3725_s1 + $0xb8] sm:$0xff]   ;;  %2448 = vmatprep.subr.bf16.mxu1 %v2492_v2  ;;  %2428 = vmatprep.subr.bf16.mxu0 %v2494_v4  ;;  %v2497_v7 = vld [vmem:[%s3725_s1 + $0xb0] sm:$0xff]   ;;  %v2501_v11 = vld [vmem:[%s3725_s1 + $0xa8] sm:$0xff]  }
   0x5   :  { %2449 = vmatpush3.bf16.msra.mxu1 %v2493_v3  ;;  %v2502_v12 = vld [vmem:[%s3725_s1 + $0x60] sm:$0xff]   ;;  %v2506_v16 = vld [vmem:[%s3725_s1 + $0x58] sm:$0xff]   ;;  %v2510_v20 = vld [vmem:[%s3725_s1 + $0x50] sm:$0xff]  }
   0x6   :  { %2450 = vmatprep.subr.bf16.mxu1 %v2496_v6  ;;  %v2503_v13 = vld [vmem:[%s3725_s1 + $0x20] sm:$0xff]   ;;  %v2507_v17 = vld [vmem:[%s3725_s1 + $0x18] sm:$0xff]   ;;  %v2511_v21 = vld [vmem:[%s3725_s1 + $0x10] sm:$0xff]  }
   0x7   :  { %2429 = vmatpush3.bf16.msra.mxu0 %v2495_v5  ;;  %v2504_v14 = vld [vmem:[%s3725_s1 + $0xe0] sm:$0xff]   ;;  %v2508_v18 = vld [vmem:[%s3725_s1 + $0xd8] sm:$0xff]   ;;  %v2512_v22 = vld [vmem:[%s3725_s1 + $0xd0] sm:$0xff]  }
   0x8   :  { %2430 = vmatprep.subr.bf16.mxu0 %v2498_v8  ;;  %v2505_v15 = vld [vmem:[%s3725_s1 + $0xa0] sm:$0xff]   ;;  %v2509_v19 = vld [vmem:[%s3725_s1 + $0x98] sm:$0xff]   ;;  %v2513_v23 = vld [vmem:[%s3725_s1 + $0x90] sm:$0xff]  }
   0x9   :  { %2451 = vmatpush3.bf16.msra.mxu1 %v2497_v7  ;;  %v2514_v24 = vld [vmem:[%s3725_s1 + $0x48] sm:$0xff]   ;;  %v2518_v28 = vld [vmem:[%s3725_s1 + $0x40] sm:$0xff]   ;;  %v2527_v39 = vld [vmem:[%s3725_s1 + $0x118] sm:$0xff]  }
   0xa   :  { %2452 = vmatprep.subr.bf16.mxu1 %v2500_v10  ;;  %v2515_v25 = vld [vmem:[%s3725_s1 + $0x8] sm:$0xff]   ;;  %v2519_v29 = vld [vmem:[%s3725_s1] sm:$0xff]   ;;  %v2528_v40 = vld [vmem:[%s3725_s1 + $0x110] sm:$0xff]  }
   0xb   :  { %2431 = vmatpush3.bf16.msra.mxu0 %v2499_v9  ;;  %v2516_v26 = vld [vmem:[%s3725_s1 + $0xc8] sm:$0xff]   ;;  %v2520_v30 = vld [vmem:[%s3725_s1 + $0xc0] sm:$0xff]   ;;  %v2523_v43 = vld [vmem:[%s3726_s0 + $0x10] ss:$0 sps:$4 sm:$0xff]  }
   0xc   :  { %2432 = vmatprep.subr.bf16.mxu0 %v2502_v12  ;;  %v2517_v27 = vld [vmem:[%s3725_s1 + $0x88] sm:$0xff]   ;;  %v27_v31 = vld [vmem:[%s3726_s0] sm:$0xff] }
   0xd   :  { %2453 = vmatpush3.bf16.msra.mxu1 %v2501_v11  ;;  %v2174_v32 = vcombine.low %v27_v31, %v27_v31  ;;  %v2175_v33 = vcombine.high %v27_v31, %v27_v31  ;;  %v2524_v34 = vld [vmem:[%s3725_s1 + $0x80] sm:$0xff]   ;;  %v28_v36 = vld [vmem:[%s3726_s0 + $0x8] sm:$0xff] }
   0xe   :  { %2454 = vmatprep.subr.bf16.mxu1 %v2504_v14  ;;  %v2176_v37 = vcombine.low %v28_v36, %v28_v36  ;;  %v2177_v38 = vcombine.high %v28_v36, %v28_v36  ;;  %v2529_v41 = vld [vmem:[%s3725_s1 + $0x108] sm:$0xff]   ;;  %v2530_v42 = vld [vmem:[%s3725_s1 + $0x100] sm:$0xff]  }
   0xf   :  { %2433 = vmatpush3.bf16.msra.mxu0 %v2503_v13  ;;  %378 = vmatprep.mubr.bf16.mxu0 %v2175_v33  ;;  %v2533_v44 = vld [vmem:[%s3727_s3 + $0x64] ss:$16 sps:$4 sm:$0xff]   ;;  %v2531_v45 = vld [vmem:[%s3727_s3 + $0x60] ss:$16 sps:$4 sm:$0xff]   ;;  %v2534_v46 = vld [vmem:[%s3727_s3 + $0x68] ss:$16 sps:$4 sm:$0xff]  }
  0x10   :  { %2434 = vmatprep.subr.bf16.mxu0 %v2506_v16  ;;  %418 = vmatprep.mubr.bf16.mxu1 %v2177_v38  ;;  %v2536_v47 = vld [vmem:[%s3727_s3 + $0x6c] ss:$16 sps:$4 sm:$0xff]   ;;  %v2537_v48 = vld [vmem:[%s3727_s3 + $0x40] ss:$16 sps:$4 sm:$0xff]   ;;  %v2539_v49 = vld [vmem:[%s3727_s3 + $0x44] ss:$16 sps:$4 sm:$0xff]  }
  0x11   :  { %2455 = vmatpush3.bf16.msra.mxu1 %v2505_v15  ;;  %v2540_v50 = vld [vmem:[%s3727_s3 + $0x48] ss:$16 sps:$4 sm:$0xff]   ;;  %v2542_v51 = vld [vmem:[%s3727_s3 + $0x4c] ss:$16 sps:$4 sm:$0xff]   ;;  %v2545_v52 = vld [vmem:[%s3727_s3 + $0x24] ss:$16 sps:$4 sm:$0xff]  }
  0x12   :  { %2456 = vmatprep.subr.bf16.mxu1 %v2508_v18  ;;  %v2543_v53 = vld [vmem:[%s3727_s3 + $0x20] ss:$16 sps:$4 sm:$0xff]   ;;  %v2548_v54 = vld [vmem:[%s3727_s3 + $0x2c] ss:$16 sps:$4 sm:$0xff]   ;;  %v2546_v55 = vld [vmem:[%s3727_s3 + $0x28] ss:$16 sps:$4 sm:$0xff]  }
  0x13   :  { %2435 = vmatpush3.bf16.msra.mxu0 %v2507_v17  ;;  %v2551_v56 = vld [vmem:[%s3727_s3 + $0x4] ss:$16 sps:$4 sm:$0xff]   ;;  %v2554_v57 = vld [vmem:[%s3727_s3 + $0xc] ss:$16 sps:$4 sm:$0xff]   ;;  %v2549_v58 = vld [vmem:[%s3727_s3] ss:$16 sps:$4 sm:$0xff]  }
  0x14   :  { %2436 = vmatprep.subr.bf16.mxu0 %v2510_v20  ;;  %v2552_v59 = vld [vmem:[%s3727_s3 + $0x8] ss:$16 sps:$4 sm:$0xff]   ;;  %v2557_v61 = vld [vmem:[%s3728_s5 + $0x154] ss:$24 sps:$4 sm:$0xff]   ;;  %v2173_v7 = vld [vmem:[%s3729_s2] ss:$0 sm:$0xff] }
  0x15   :  { %2457 = vmatpush3.bf16.msra.mxu1 %v2509_v19  ;;  %v2560_v62 = vld [vmem:[%s3728_s5 + $0x454] ss:$24 sps:$4 sm:$0xff]   ;;  %v2555_v17 = vld [vmem:[%s3728_s5 + $0x150] ss:$24 sps:$4 sm:$0xff]   ;;  %v2563_v20 = vld [vmem:[%s3728_s5 + $0x124] ss:$24 sps:$4 sm:$0xff]  }
  0x16   :  { %2458 = vmatprep.subr.bf16.mxu1 %v2512_v22  ;;  %v2558_v18 = vld [vmem:[%s3728_s5 + $0x450] ss:$24 sps:$4 sm:$0xff]   ;;  %v2573_v31 = vld [vmem:[%s3728_s5 + $0xc0] ss:$24 sps:$4 sm:$0xff]   ;;  %v2581_v33 = vld [vmem:[%s3728_s5 + $0x94] ss:$24 sps:$4 sm:$0xff]  }
  0x17   :  { %2437 = vmatpush3.bf16.msra.mxu0 %v2511_v21  ;;  %v2566_v21 = vld [vmem:[%s3728_s5 + $0x424] ss:$24 sps:$4 sm:$0xff]   ;;  %v2582_v36 = vld [vmem:[%s3728_s5 + $0x390] ss:$24 sps:$4 sm:$0xff]  }
  0x18   :  { %2438 = vmatprep.subr.bf16.mxu0 %v2514_v24  ;;  %v2564_v24 = vld [vmem:[%s3728_s5 + $0x420] ss:$24 sps:$4 sm:$0xff]   ;;  %v2590_v38 = vld [vmem:[%s3728_s5 + $0x364] ss:$24 sps:$4 sm:$0xff]  }
  0x19   :  { %2459 = vmatpush3.bf16.msra.mxu1 %v2513_v23  ;;  %v2561_v23 = vld [vmem:[%s3728_s5 + $0x120] ss:$24 sps:$4 sm:$0xff]  }
  0x1a   :  { %2460 = vmatprep.subr.bf16.mxu1 %v2516_v26  ;;  %v2572_v26 = vld [vmem:[%s3728_s5 + $0x3f4] ss:$24 sps:$4 sm:$0xff]  }
  0x1b   :  { %2439 = vmatpush3.bf16.msra.mxu0 %v2515_v25  ;;  %v2569_v25 = vld [vmem:[%s3728_s5 + $0xf4] ss:$24 sps:$4 sm:$0xff]  }
  0x1c   :  { %2440 = vmatprep.subr.bf16.mxu0 %v2518_v28  ;;  %v2570_v28 = vld [vmem:[%s3728_s5 + $0x3f0] ss:$24 sps:$4 sm:$0xff]  }
  0x1d   :  { %2461 = vmatpush3.bf16.msra.mxu1 %v2517_v27  ;;  %v2567_v27 = vld [vmem:[%s3728_s5 + $0xf0] ss:$24 sps:$4 sm:$0xff]  }
  0x1e   :  { %2462 = vmatprep.subr.bf16.mxu1 %v2520_v30  ;;  %v2578_v30 = vld [vmem:[%s3728_s5 + $0x3c4] ss:$24 sps:$4 sm:$0xff]  }
  0x1f   :  { %2441 = vmatpush3.bf16.msra.mxu0 %v2519_v29  ;;  %v2575_v29 = vld [vmem:[%s3728_s5 + $0xc4] ss:$24 sps:$4 sm:$0xff]  }
  0x20   :  { %2475 = vmatprep.subr.bf16.mxu0 %v2867_v35 }
  0x21   :  { %2463 = vmatpush3.bf16.msra.mxu1 %v2524_v34  ;;  %v2584_v34 = vld [vmem:[%s3728_s5 + $0x394] ss:$24 sps:$4 sm:$0xff]  }
  0x22   :  { %379 = vmatmul.mubr.bf16.vlgmr.msra.gmra.mxu0 %v2174_v32  ;;  %597 = vmatprep.subr.bf16.mxu1 %v2533_v44  ;;  %v2576_v32 = vld [vmem:[%s3728_s5 + $0x3c0] ss:$24 sps:$4 sm:$0xff]   ;;  %v2594_v44 = vld [vmem:[%s3728_s5 + $0x330] ss:$24 sps:$4 sm:$0xff]  }
  0x23   :  { %2476 = vmatpush3.bf16.msra.mxu0 %v2527_v39  ;;  %2483 = vmatprep.mubr.msk.bf16.mxu0 %vm2868_vm0, %v2867_v35  ;;  %v2585_v39 = vld [vmem:[%s3728_s5 + $0x60] ss:$24 sps:$4 sm:$0xff]  }
  0x24   :  { %419 = vmatmul.mubr.bf16.vlgmr.msra.gmra.mxu1 %v2176_v37  ;;  %2477 = vmatprep.subr.bf16.mxu0 %v2867_v35  ;;  %v2587_v37 = vld [vmem:[%s3728_s5 + $0x64] ss:$24 sps:$4 sm:$0xff]  }
  0x25   :  { %598 = vmatpush1.bf16.msra.mxu1 %v2531_v45  ;;  %621 = vmatprep.mubr.bf16.mxu1 %v2869_v60  ;;  %v2599_v45 = vld [vmem:[%s3728_s5 + $0x4] ss:$24 sps:$4 sm:$0xff]  }
  0x26   :  { %599 = vmatprep.subr.bf16.mxu1 %v2539_v49  ;;  %v2605_v49 = vld [vmem:[%s3728_s5 + $0x2d4] ss:$24 sps:$4 sm:$0xff]  }
  0x27   :  { %2478 = vmatpush3.bf16.msra.mxu0 %v2528_v40  ;;  %v2588_v40 = vld [vmem:[%s3728_s5 + $0x360] ss:$24 sps:$4 sm:$0xff]  }
  0x28   :  { %2479 = vmatprep.subr.bf16.mxu0 %v2867_v35 }
  0x29   :  { %600 = vmatpush1.bf16.msra.mxu1 %v2537_v48  ;;  %v2600_v48 = vld [vmem:[%s3728_s5 + $0x300] ss:$24 sps:$4 sm:$0xff]  }
  0x2a   :  { %601 = vmatprep.subr.bf16.mxu1 %v2545_v52  ;;  %v2606_v52 = vld [vmem:[%s3728_s5 + $0x5d0] ss:$24 sps:$4 sm:$0xff]  }
  0x2b   :  { %2480 = vmatpush3.bf16.msra.mxu0 %v2529_v41  ;;  %v2593_v41 = vld [vmem:[%s3728_s5 + $0x34] ss:$24 sps:$4 sm:$0xff]  }
  0x2c   :  { %2481 = vmatprep.subr.bf16.mxu0 %v2867_v35  ;;  %v2579_v35 = vld [vmem:[%s3728_s5 + $0x90] ss:$24 sps:$4 sm:$0xff]  }
  0x2d   :  { %602 = vmatpush1.bf16.msra.mxu1 %v2543_v53  ;;  %v2611_v53 = vld [vmem:[%s3728_s5 + $0x2a4] ss:$24 sps:$4 sm:$0xff]  }
  0x2e   :  { %603 = vmatprep.subr.bf16.mxu1 %v2551_v56  ;;  %v2612_v56 = vld [vmem:[%s3728_s5 + $0x5a0] ss:$24 sps:$4 sm:$0xff]  }
  0x2f   :  { %2482 = vmatpush3.bf16.msra.mxu0 %v2530_v42  ;;  %v2596_v42 = vld [vmem:[%s3728_s5 + $0x334] ss:$24 sps:$4 sm:$0xff]  }
  0x30   :  { %638 = vmatprep.subr.bf16.mxu0 %v2536_v47  ;;  %v2597_v47 = vld [vmem:[%s3728_s5] ss:$24 sps:$4 sm:$0xff]  }
  0x31   :  { %604 = vmatpush1.bf16.msra.mxu1 %v2549_v58  ;;  %v2620_v58 = vld [vmem:[%s3728_s5 + $0x574] ss:$24 sps:$4 sm:$0xff]  }
  0x32   :  { %2484 = vmatmul.mubr.msk.bf16.vlgmr.msra.gmra.mxu0 %vm342_vm1, %v2523_v43  ;;  %1863 = vmatprep.subr.bf16.mxu1 %v2557_v61  ;;  %v2591_v43 = vld [vmem:[%s3728_s5 + $0x30] ss:$24 sps:$4 sm:$0xff]   ;;  %v2623_v61 = vld [vmem:[%s3728_s5 + $0x244] ss:$24 sps:$4 sm:$0xff]  }
  0x33   :  { %639 = vmatpush1.bf16.msra.mxu0 %v2534_v46  ;;  %662 = vmatprep.mubr.bf16.mxu0 %v2869_v60  ;;  %v2602_v46 = vld [vmem:[%s3728_s5 + $0x304] ss:$24 sps:$4 sm:$0xff]   ;;  %v2618_v60 = vld [vmem:[%s3728_s5 + $0x570] ss:$24 sps:$4 sm:$0xff]  }
  0x34   :  { %640 = vmatprep.subr.bf16.mxu0 %v2542_v51  ;;  %v2603_v51 = vld [vmem:[%s3728_s5 + $0x2d0] ss:$24 sps:$4 sm:$0xff]  }
  0x37   :  { %641 = vmatpush1.bf16.msra.mxu0 %v2540_v50  ;;  %v2608_v50 = vld [vmem:[%s3728_s5 + $0x5d4] ss:$24 sps:$4 sm:$0xff]  }
  0x38   :  { %642 = vmatprep.subr.bf16.mxu0 %v2548_v54  ;;  %v2614_v54 = vld [vmem:[%s3728_s5 + $0x5a4] ss:$24 sps:$4 sm:$0xff]  }
  0x3b   :  { %643 = vmatpush1.bf16.msra.mxu0 %v2546_v55  ;;  %v2609_v55 = vld [vmem:[%s3728_s5 + $0x2a0] ss:$24 sps:$4 sm:$0xff]  }
  0x3c   :  { %644 = vmatprep.subr.bf16.mxu0 %v2554_v57  ;;  %v2617_v57 = vld [vmem:[%s3728_s5 + $0x274] ss:$24 sps:$4 sm:$0xff]  }
  0x3f   :  { %645 = vmatpush1.bf16.msra.mxu0 %v2552_v59  ;;  %v2615_v59 = vld [vmem:[%s3728_s5 + $0x270] ss:$24 sps:$4 sm:$0xff]  }
  0x40   :  { %1904 = vmatprep.subr.bf16.mxu0 %v2560_v62  ;;  %v2626_v62 = vld [vmem:[%s3728_s5 + $0x544] ss:$24 sps:$4 sm:$0xff]  }
  0xe2   :  { %v2442_v63 = vpop.f32.mrf.mxu0 }
  0xe4   :  { %v2443_v0 = vpop.f32.mrf.mxu0  ;;  %v2464_v1 = vpop.f32.mrf.mxu1 }
  0xe5   :  { %v2444_v6 = vadd.f32 %v2443_v0, %v2442_v63  ;;  %v2621_v63 = vld [vmem:[%s3728_s5 + $0x240] ss:$24 sps:$4 sm:$0xff]  }
  0xe6   :  { %v2445_v2 = vpop.f32.mrf.mxu0  ;;  %v2465_v3 = vpop.f32.mrf.mxu1  ;;  %v2624_v0 = vld [vmem:[%s3728_s5 + $0x540] ss:$24 sps:$4 sm:$0xff]  }
  0xe7   :  { %v381_v9 = vadd.f32 %v2444_v6, %v2173_v7  ;;  %v2466_v10 = vadd.f32 %v2465_v3, %v2464_v1  ;;  %v2629_v1 = vld [vmem:[%s3728_s5 + $0x214] ss:$24 sps:$4 sm:$0xff]   ;;  %v2627_v3 = vld [vmem:[%s3728_s5 + $0x210] ss:$24 sps:$4 sm:$0xff]   ;;  %v2638_v6 = vld [vmem:[%s3728_s5 + $0x4e4] ss:$24 sps:$4 sm:$0xff]  }
  0xe8   :  { %v2446_v4 = vpop.f32.mrf.mxu0  ;;  %v2467_v5 = vpop.f32.mrf.mxu1  ;;  %v2632_v2 = vld [vmem:[%s3728_s5 + $0x514] ss:$24 sps:$4 sm:$0xff]   ;;  %v2633_v7 = vld [vmem:[%s3728_s5 + $0x1e0] ss:$24 sps:$4 sm:$0xff]  }
  0xe9   :  { %v421_v11 = vadd.f32 %v2466_v10, %v381_v9  ;;  %v2630_v4 = vld [vmem:[%s3728_s5 + $0x510] ss:$24 sps:$4 sm:$0xff]   ;;  %v2635_v5 = vld [vmem:[%s3728_s5 + $0x1e4] ss:$24 sps:$4 sm:$0xff]   ;;  %v2641_v9 = vld [vmem:[%s3728_s5 + $0x1b4] ss:$24 sps:$4 sm:$0xff]  }
  0xea   :  { %v2468_v8 = vpop.f32.mrf.mxu1  ;;  %v2644_v10 = vld [vmem:[%s3728_s5 + $0x4b4] ss:$24 sps:$4 sm:$0xff]  }
  0xeb   :  { %v2636_v8 = vld [vmem:[%s3728_s5 + $0x4e0] ss:$24 sps:$4 sm:$0xff]  }
  0xf2   :  { %v460_v12 = vpop.f32.mrf.mxu0 }
  0xf3   :  { %v461_v13 = vadd.f32 %v460_v12, %v421_v11  ;;  %v2639_v11 = vld [vmem:[%s3728_s5 + $0x1b0] ss:$24 sps:$4 sm:$0xff]  }
  0xf4   :  { %v2485_v14 = vpop.f32.mrf.mxu0  ;;  %v2642_v12 = vld [vmem:[%s3728_s5 + $0x4b0] ss:$24 sps:$4 sm:$0xff]  }
  0xf5   :  { %v466_v15 = vmax.f32 %v461_v13, 0.0  ;;  %v2647_v13 = vld [vmem:[%s3728_s5 + $0x184] ss:$24 sps:$4 sm:$0xff]  }
  0xf6   :  { %v463_v16 = vpop.f32.mrf.mxu0  ;;  %v2650_v14 = vld [vmem:[%s3728_s5 + $0x484] ss:$24 sps:$4 sm:$0xff]  }
  0xf7   :  { %v467_v19 = vpack.c.bf16 %v466_v15, %v466_v15  ;;  %v2645_v15 = vld [vmem:[%s3728_s5 + $0x180] ss:$24 sps:$4 sm:$0xff]  }
  0xf8   :  { %v2486_v22 = vpop.f32.mrf.mxu0  ;;  %v2648_v16 = vld [vmem:[%s3728_s5 + $0x480] ss:$24 sps:$4 sm:$0xff]  }
  0xf9   :  { %2232 = vmatmul.mubr.msk.bf16.vlgmr.msra.gmra.mxu1 %vm342_vm1, %v467_v19  ;;  %2233 = vmatmul.mubr.msk.bf16.vlgmr.msra.gmra.mxu0 %vm342_vm1, %v467_v19  ;;  %v486_v19 = vlaneseq }
  0xfa   :  { %1864 = vmatpush1.bf16.msra.mxu1 %v2555_v17  ;;  %1905 = vmatpush1.bf16.msra.mxu0 %v2558_v18  ;;  %v2653_v17 = vld [vmem:[%s3728_s5 + $0x15c] ss:$24 sps:$4 sm:$0xff]  }
  0xfb   :  { %1865 = vmatprep.subr.bf16.mxu1 %v2563_v20  ;;  %1906 = vmatprep.subr.bf16.mxu0 %v2566_v21  ;;  %v2656_v18 = vld [vmem:[%s3728_s5 + $0x45c] ss:$24 sps:$4 sm:$0xff]   ;;  %v3279_v20 = vshrl.u32 %v486_v19, 7  ;;  %v2702_v19 = vld [vmem:[%s3728_s5 + $0x5d8] ss:$24 sps:$4 sm:$0xff]  }
  0xfd   :  { %v488_v21 = vsub.s32 0, %v3279_v20  ;;  %v496_v22 = vsub.s32 2, %v3279_v20 }
  0xfe   :  { %1866 = vmatpush1.bf16.msra.mxu1 %v2561_v23  ;;  %1907 = vmatpush1.bf16.msra.mxu0 %v2564_v24  ;;  %v484_v23 = vld [vmem:[%s3730_s4] sm:$0xf]  ;;  %v492_v24 = vsub.s32 1, %v3279_v20 }
  0xff   :  { %1867 = vmatprep.subr.bf16.mxu1 %v2569_v25  ;;  %1908 = vmatprep.subr.bf16.mxu0 %v2572_v26  ;;  %v500_v25 = vsub.s32 3, %v3279_v20  ;;  %v489_v26 = vrot.slane %v484_v23, %v488_v21 }
 0x102   :  { %1868 = vmatpush1.bf16.msra.mxu1 %v2567_v27  ;;  %1909 = vmatpush1.bf16.msra.mxu0 %v2570_v28  ;;  %v497_v27 = vrot.slane %v484_v23, %v496_v22  ;;  %v493_v28 = vrot.slane %v484_v23, %v492_v24 }
 0x103   :  { %1869 = vmatprep.subr.bf16.mxu1 %v2575_v29  ;;  %1910 = vmatprep.subr.bf16.mxu0 %v2578_v30  ;;  %v501_v29 = vrot.slane %v484_v23, %v500_v25  ;;  %v2707_v23 = vld [vmem:[%s3728_s5 + $0x2ac] ss:$24 sps:$4 sm:$0xff]  }
 0x106   :  { %1870 = vmatpush1.bf16.msra.mxu1 %v2573_v31  ;;  %1911 = vmatpush1.bf16.msra.mxu0 %v2576_v32 }
 0x107   :  { %1871 = vmatprep.subr.bf16.mxu1 %v2581_v33  ;;  %1912 = vmatprep.subr.bf16.mxu0 %v2584_v34 }
 0x10a   :  { %1872 = vmatpush1.bf16.msra.mxu1 %v2579_v35  ;;  %1913 = vmatpush1.bf16.msra.mxu0 %v2582_v36 }
 0x10b   :  { %1873 = vmatprep.subr.bf16.mxu1 %v2587_v37  ;;  %1914 = vmatprep.subr.bf16.mxu0 %v2590_v38 }
 0x10e   :  { %1874 = vmatpush1.bf16.msra.mxu1 %v2585_v39  ;;  %1915 = vmatpush1.bf16.msra.mxu0 %v2588_v40 }
 0x10f   :  { %1875 = vmatprep.subr.bf16.mxu1 %v2593_v41  ;;  %1916 = vmatprep.subr.bf16.mxu0 %v2596_v42 }
 0x112   :  { %1876 = vmatpush1.bf16.msra.mxu1 %v2591_v43  ;;  %1917 = vmatpush1.bf16.msra.mxu0 %v2594_v44 }
 0x113   :  { %1877 = vmatprep.subr.bf16.mxu1 %v2599_v45  ;;  %1918 = vmatprep.subr.bf16.mxu0 %v2602_v46 }
 0x116   :  { %1878 = vmatpush1.bf16.msra.mxu1 %v2597_v47  ;;  %1919 = vmatpush1.bf16.msra.mxu0 %v2600_v48  ;;  %v2651_v48 = vld [vmem:[%s3728_s5 + $0x158] ss:$24 sps:$4 sm:$0xff]  }
 0x117   :  { %1879 = vmatprep.subr.bf16.mxu1 %v2605_v49  ;;  %1920 = vmatprep.subr.bf16.mxu0 %v2608_v50  ;;  %v2654_v49 = vld [vmem:[%s3728_s5 + $0x458] ss:$24 sps:$4 sm:$0xff]  }
 0x11a   :  { %1880 = vmatpush2.bf16.msra.mxu1 %v2603_v51  ;;  %1921 = vmatpush2.bf16.msra.mxu0 %v2606_v52  ;;  %v2659_v52 = vld [vmem:[%s3728_s5 + $0x12c] ss:$24 sps:$4 sm:$0xff]  }
 0x11b   :  { %1881 = vmatprep.subr.bf16.mxu1 %v2611_v53  ;;  %1922 = vmatprep.subr.bf16.mxu0 %v2614_v54  ;;  %v2662_v53 = vld [vmem:[%s3728_s5 + $0x42c] ss:$24 sps:$4 sm:$0xff]   ;;  %v2657_v54 = vld [vmem:[%s3728_s5 + $0x128] ss:$24 sps:$4 sm:$0xff]  }
 0x11e   :  { %1882 = vmatpush2.bf16.msra.mxu1 %v2609_v55  ;;  %1923 = vmatpush2.bf16.msra.mxu0 %v2612_v56  ;;  %v2660_v55 = vld [vmem:[%s3728_s5 + $0x428] ss:$24 sps:$4 sm:$0xff]   ;;  %v2665_v56 = vld [vmem:[%s3728_s5 + $0xfc] ss:$24 sps:$4 sm:$0xff]  }
 0x11f   :  { %1883 = vmatprep.subr.bf16.mxu1 %v2617_v57  ;;  %1924 = vmatprep.subr.bf16.mxu0 %v2620_v58  ;;  %v2668_v57 = vld [vmem:[%s3728_s5 + $0x3fc] ss:$24 sps:$4 sm:$0xff]   ;;  %v2663_v58 = vld [vmem:[%s3728_s5 + $0xf8] ss:$24 sps:$4 sm:$0xff]  }
 0x122   :  { %1884 = vmatpush2.bf16.msra.mxu1 %v2615_v59  ;;  %1925 = vmatpush2.bf16.msra.mxu0 %v2618_v60  ;;  %v2666_v59 = vld [vmem:[%s3728_s5 + $0x3f8] ss:$24 sps:$4 sm:$0xff]   ;;  %v2671_v60 = vld [vmem:[%s3728_s5 + $0xcc] ss:$24 sps:$4 sm:$0xff]  }
 0x123   :  { %1885 = vmatprep.subr.bf16.mxu1 %v2623_v61  ;;  %1926 = vmatprep.subr.bf16.mxu0 %v2626_v62  ;;  %v2674_v61 = vld [vmem:[%s3728_s5 + $0x3cc] ss:$24 sps:$4 sm:$0xff]   ;;  %v2669_v62 = vld [vmem:[%s3728_s5 + $0xc8] ss:$24 sps:$4 sm:$0xff]  }
 0x126   :  { %1886 = vmatpush2.bf16.msra.mxu1 %v2621_v63  ;;  %1927 = vmatpush2.bf16.msra.mxu0 %v2624_v0  ;;  %v2672_v63 = vld [vmem:[%s3728_s5 + $0x3c8] ss:$24 sps:$4 sm:$0xff]   ;;  %v2677_v0 = vld [vmem:[%s3728_s5 + $0x9c] ss:$24 sps:$4 sm:$0xff]  }
 0x127   :  { %1887 = vmatprep.subr.bf16.mxu1 %v2629_v1  ;;  %1928 = vmatprep.subr.bf16.mxu0 %v2632_v2  ;;  %v2680_v1 = vld [vmem:[%s3728_s5 + $0x39c] ss:$24 sps:$4 sm:$0xff]   ;;  %v2675_v2 = vld [vmem:[%s3728_s5 + $0x98] ss:$24 sps:$4 sm:$0xff]  }
 0x12a   :  { %1888 = vmatpush2.bf16.msra.mxu1 %v2627_v3  ;;  %1929 = vmatpush2.bf16.msra.mxu0 %v2630_v4  ;;  %v2678_v3 = vld [vmem:[%s3728_s5 + $0x398] ss:$24 sps:$4 sm:$0xff]   ;;  %v2683_v4 = vld [vmem:[%s3728_s5 + $0x6c] ss:$24 sps:$4 sm:$0xff]  }
 0x12b   :  { %1889 = vmatprep.subr.bf16.mxu1 %v2635_v5  ;;  %1930 = vmatprep.subr.bf16.mxu0 %v2638_v6  ;;  %v2686_v5 = vld [vmem:[%s3728_s5 + $0x36c] ss:$24 sps:$4 sm:$0xff]   ;;  %v2681_v6 = vld [vmem:[%s3728_s5 + $0x68] ss:$24 sps:$4 sm:$0xff]  }
 0x12e   :  { %1890 = vmatpush2.bf16.msra.mxu1 %v2633_v7  ;;  %1931 = vmatpush2.bf16.msra.mxu0 %v2636_v8  ;;  %v2684_v7 = vld [vmem:[%s3728_s5 + $0x368] ss:$24 sps:$4 sm:$0xff]   ;;  %v2689_v8 = vld [vmem:[%s3728_s5 + $0x3c] ss:$24 sps:$4 sm:$0xff]  }
 0x12f   :  { %1891 = vmatprep.subr.bf16.mxu1 %v2641_v9  ;;  %1932 = vmatprep.subr.bf16.mxu0 %v2644_v10  ;;  %v2692_v9 = vld [vmem:[%s3728_s5 + $0x33c] ss:$24 sps:$4 sm:$0xff]   ;;  %v2687_v10 = vld [vmem:[%s3728_s5 + $0x38] ss:$24 sps:$4 sm:$0xff]  }
 0x132   :  { %1892 = vmatpush2.bf16.msra.mxu1 %v2639_v11  ;;  %1933 = vmatpush2.bf16.msra.mxu0 %v2642_v12  ;;  %v2690_v11 = vld [vmem:[%s3728_s5 + $0x338] ss:$24 sps:$4 sm:$0xff]   ;;  %v2695_v12 = vld [vmem:[%s3728_s5 + $0xc] ss:$24 sps:$4 sm:$0xff]  }
 0x133   :  { %1893 = vmatprep.subr.bf16.mxu1 %v2647_v13  ;;  %1934 = vmatprep.subr.bf16.mxu0 %v2650_v14  ;;  %v2698_v13 = vld [vmem:[%s3728_s5 + $0x30c] ss:$24 sps:$4 sm:$0xff]   ;;  %v2693_v14 = vld [vmem:[%s3728_s5 + $0x8] ss:$24 sps:$4 sm:$0xff]  }
 0x136   :  { %1894 = vmatpush2.bf16.msra.mxu1 %v2645_v15  ;;  %1935 = vmatpush2.bf16.msra.mxu0 %v2648_v16  ;;  %v2696_v15 = vld [vmem:[%s3728_s5 + $0x308] ss:$24 sps:$4 sm:$0xff]   ;;  %v2701_v16 = vld [vmem:[%s3728_s5 + $0x2dc] ss:$24 sps:$4 sm:$0xff]  }
 0x137   :  { %1945 = vmatprep.subr.bf16.mxu1 %v2653_v17  ;;  %1986 = vmatprep.subr.bf16.mxu0 %v2656_v18  ;;  %v2704_v17 = vld [vmem:[%s3728_s5 + $0x5dc] ss:$24 sps:$4 sm:$0xff]   ;;  %v2699_v18 = vld [vmem:[%s3728_s5 + $0x2d8] ss:$24 sps:$4 sm:$0xff]  }
 0x1b9   :  { %v623_v30 = vpop.f32.mrf.mxu1  ;;  %v664_v31 = vpop.f32.mrf.mxu0 }
 0x1ba   :  { %v624_v32 = vadd.f32 %v623_v30, %v489_v26  ;;  %v665_v33 = vadd.f32 %v664_v31, %v497_v27  ;;  %v2710_v26 = vld [vmem:[%s3728_s5 + $0x5ac] ss:$24 sps:$4 sm:$0xff]   ;;  %v2705_v27 = vld [vmem:[%s3728_s5 + $0x2a8] ss:$24 sps:$4 sm:$0xff]   ;;  %v2716_v30 = vld [vmem:[%s3728_s5 + $0x57c] ss:$24 sps:$4 sm:$0xff]  }
 0x1bb   :  { %v625_v34 = vpop.f32.mrf.mxu1  ;;  %v666_v35 = vpop.f32.mrf.mxu0  ;;  %v2711_v31 = vld [vmem:[%s3728_s5 + $0x278] ss:$24 sps:$4 sm:$0xff]  }
 0x1bc   :  { %v626_v36 = vadd.f32 %v625_v34, %v493_v28  ;;  %v667_v37 = vadd.f32 %v666_v35, %v501_v29  ;;  %v671_v38 = vmax.f32 %v624_v32, 0.0  ;;  %v673_v39 = vmax.f32 %v665_v33, 0.0  ;;  %v2708_v28 = vld [vmem:[%s3728_s5 + $0x5a8] ss:$24 sps:$4 sm:$0xff]   ;;  %v2713_v29 = vld [vmem:[%s3728_s5 + $0x27c] ss:$24 sps:$4 sm:$0xff]  }
 0x1bd   :  { %v627_v40 = vpop.f32.mrf.mxu1  ;;  %v668_v41 = vpop.f32.mrf.mxu0  ;;  %v2714_v32 = vld [vmem:[%s3728_s5 + $0x578] ss:$24 sps:$4 sm:$0xff]   ;;  %v2719_v33 = vld [vmem:[%s3728_s5 + $0x24c] ss:$24 sps:$4 sm:$0xff]   ;;  %v2717_v35 = vld [vmem:[%s3728_s5 + $0x248] ss:$24 sps:$4 sm:$0xff]  }
 0x1be   :  { %v672_v42 = vmax.f32 %v626_v36, 0.0  ;;  %v674_v43 = vmax.f32 %v667_v37, 0.0  ;;  %v3306_v50 = vpack.c.bf16 %v671_v38, %v671_v38  ;;  %v3308_v51 = vpack.c.bf16 %v673_v39, %v673_v39  ;;  %v2722_v34 = vld [vmem:[%s3728_s5 + $0x54c] ss:$24 sps:$4 sm:$0xff]   ;;  %v2720_v36 = vld [vmem:[%s3728_s5 + $0x548] ss:$24 sps:$4 sm:$0xff]  }
 0x1bf   :  { %v628_v44 = vpop.f32.mrf.mxu1  ;;  %v669_v45 = vpop.f32.mrf.mxu0  ;;  %v2725_v37 = vld [vmem:[%s3728_s5 + $0x21c] ss:$24 sps:$4 sm:$0xff]   ;;  %v2723_v39 = vld [vmem:[%s3728_s5 + $0x218] ss:$24 sps:$4 sm:$0xff]   ;;  %v2731_v41 = vld [vmem:[%s3728_s5 + $0x1ec] ss:$24 sps:$4 sm:$0xff]  }
 0x1c0   :  { %v3296_v46 = vpack.c.bf16 %v672_v42, %v672_v42  ;;  %v3298_v47 = vpack.c.bf16 %v674_v43, %v674_v43  ;;  %v2728_v38 = vld [vmem:[%s3728_s5 + $0x51c] ss:$24 sps:$4 sm:$0xff]   ;;  %v2726_v40 = vld [vmem:[%s3728_s5 + $0x518] ss:$24 sps:$4 sm:$0xff]   ;;  %v2734_v42 = vld [vmem:[%s3728_s5 + $0x4ec] ss:$24 sps:$4 sm:$0xff]  }
 0x1c1   :  { %v2729_v43 = vld [vmem:[%s3728_s5 + $0x1e8] ss:$24 sps:$4 sm:$0xff]   ;;  %v2737_v45 = vld [vmem:[%s3728_s5 + $0x1bc] ss:$24 sps:$4 sm:$0xff]  }
 0x1c2   :  { %1895 = vmatprep.mubr.bf16.mxu1 %v3296_v46  ;;  %1936 = vmatprep.mubr.bf16.mxu0 %v3298_v47  ;;  %v2732_v44 = vld [vmem:[%s3728_s5 + $0x4e8] ss:$24 sps:$4 sm:$0xff]  }
 0x1c3   :  { %1896 = vmatmul.mubr.bf16.vlgmr.msra.gmra.mxu1 %v3306_v50  ;;  %1937 = vmatmul.mubr.bf16.vlgmr.msra.gmra.mxu0 %v3308_v51 }
 0x1c4   :  { %1946 = vmatpush1.bf16.msra.mxu1 %v2651_v48  ;;  %1987 = vmatpush1.bf16.msra.mxu0 %v2654_v49  ;;  %v2740_v48 = vld [vmem:[%s3728_s5 + $0x4bc] ss:$24 sps:$4 sm:$0xff]   ;;  %v2735_v49 = vld [vmem:[%s3728_s5 + $0x1b8] ss:$24 sps:$4 sm:$0xff]  }
 0x1c5   :  { %1977 = vmatprep.mubr.bf16.mxu1 %v3296_v46  ;;  %2018 = vmatprep.mubr.bf16.mxu0 %v3298_v47 }
 0x1c6   :  { %1947 = vmatprep.subr.bf16.mxu1 %v2659_v52  ;;  %1988 = vmatprep.subr.bf16.mxu0 %v2662_v53  ;;  %v2738_v52 = vld [vmem:[%s3728_s5 + $0x4b8] ss:$24 sps:$4 sm:$0xff]   ;;  %v2743_v53 = vld [vmem:[%s3728_s5 + $0x18c] ss:$24 sps:$4 sm:$0xff]  }
 0x1c8   :  { %1948 = vmatpush1.bf16.msra.mxu1 %v2657_v54  ;;  %1989 = vmatpush1.bf16.msra.mxu0 %v2660_v55  ;;  %v2746_v54 = vld [vmem:[%s3728_s5 + $0x48c] ss:$24 sps:$4 sm:$0xff]   ;;  %v2741_v55 = vld [vmem:[%s3728_s5 + $0x188] ss:$24 sps:$4 sm:$0xff]  }
 0x1c9   :  { %1949 = vmatprep.subr.bf16.mxu1 %v2665_v56  ;;  %1990 = vmatprep.subr.bf16.mxu0 %v2668_v57  ;;  %v2744_v56 = vld [vmem:[%s3728_s5 + $0x488] ss:$24 sps:$4 sm:$0xff]   ;;  %v2749_v57 = vld [vmem:[%s3728_s5 + $0x164] ss:$24 sps:$4 sm:$0xff]  }
 0x1cc   :  { %1950 = vmatpush1.bf16.msra.mxu1 %v2663_v58  ;;  %1991 = vmatpush1.bf16.msra.mxu0 %v2666_v59  ;;  %v2752_v58 = vld [vmem:[%s3728_s5 + $0x464] ss:$24 sps:$4 sm:$0xff]   ;;  %v2747_v59 = vld [vmem:[%s3728_s5 + $0x160] ss:$24 sps:$4 sm:$0xff]  }
 0x1cd   :  { %1951 = vmatprep.subr.bf16.mxu1 %v2671_v60  ;;  %1992 = vmatprep.subr.bf16.mxu0 %v2674_v61  ;;  %v2750_v60 = vld [vmem:[%s3728_s5 + $0x460] ss:$24 sps:$4 sm:$0xff]   ;;  %v2755_v61 = vld [vmem:[%s3728_s5 + $0x134] ss:$24 sps:$4 sm:$0xff]  }
 0x1d0   :  { %1952 = vmatpush1.bf16.msra.mxu1 %v2669_v62  ;;  %1993 = vmatpush1.bf16.msra.mxu0 %v2672_v63  ;;  %v2758_v62 = vld [vmem:[%s3728_s5 + $0x434] ss:$24 sps:$4 sm:$0xff]   ;;  %v2753_v63 = vld [vmem:[%s3728_s5 + $0x130] ss:$24 sps:$4 sm:$0xff]  }
 0x1d1   :  { %1953 = vmatprep.subr.bf16.mxu1 %v2677_v0  ;;  %1994 = vmatprep.subr.bf16.mxu0 %v2680_v1  ;;  %v2756_v0 = vld [vmem:[%s3728_s5 + $0x430] ss:$24 sps:$4 sm:$0xff]   ;;  %v2761_v1 = vld [vmem:[%s3728_s5 + $0x104] ss:$24 sps:$4 sm:$0xff]  }
 0x1d4   :  { %1954 = vmatpush1.bf16.msra.mxu1 %v2675_v2  ;;  %1995 = vmatpush1.bf16.msra.mxu0 %v2678_v3  ;;  %v2759_v2 = vld [vmem:[%s3728_s5 + $0x100] ss:$24 sps:$4 sm:$0xff]   ;;  %v2767_v3 = vld [vmem:[%s3728_s5 + $0xd4] ss:$24 sps:$4 sm:$0xff]  }
 0x1d5   :  { %1955 = vmatprep.subr.bf16.mxu1 %v2683_v4  ;;  %1996 = vmatprep.subr.bf16.mxu0 %v2686_v5  ;;  %v2770_v4 = vld [vmem:[%s3728_s5 + $0x3d4] ss:$24 sps:$4 sm:$0xff]   ;;  %v2765_v5 = vld [vmem:[%s3728_s5 + $0xd0] ss:$24 sps:$4 sm:$0xff]  }
 0x1d8   :  { %1956 = vmatpush1.bf16.msra.mxu1 %v2681_v6  ;;  %1997 = vmatpush1.bf16.msra.mxu0 %v2684_v7  ;;  %v2768_v6 = vld [vmem:[%s3728_s5 + $0x3d0] ss:$24 sps:$4 sm:$0xff]   ;;  %v2773_v7 = vld [vmem:[%s3728_s5 + $0xa4] ss:$24 sps:$4 sm:$0xff]  }
 0x1d9   :  { %1957 = vmatprep.subr.bf16.mxu1 %v2689_v8  ;;  %1998 = vmatprep.subr.bf16.mxu0 %v2692_v9  ;;  %v2776_v8 = vld [vmem:[%s3728_s5 + $0x3a4] ss:$24 sps:$4 sm:$0xff]   ;;  %v2771_v9 = vld [vmem:[%s3728_s5 + $0xa0] ss:$24 sps:$4 sm:$0xff]  }
 0x1dc   :  { %1958 = vmatpush1.bf16.msra.mxu1 %v2687_v10  ;;  %1999 = vmatpush1.bf16.msra.mxu0 %v2690_v11  ;;  %v2774_v10 = vld [vmem:[%s3728_s5 + $0x3a0] ss:$24 sps:$4 sm:$0xff]   ;;  %v2779_v11 = vld [vmem:[%s3728_s5 + $0x74] ss:$24 sps:$4 sm:$0xff]  }
 0x1dd   :  { %1959 = vmatprep.subr.bf16.mxu1 %v2695_v12  ;;  %2000 = vmatprep.subr.bf16.mxu0 %v2698_v13  ;;  %v2782_v12 = vld [vmem:[%s3728_s5 + $0x374] ss:$24 sps:$4 sm:$0xff]   ;;  %v2777_v13 = vld [vmem:[%s3728_s5 + $0x70] ss:$24 sps:$4 sm:$0xff]  }
 0x1e0   :  { %1960 = vmatpush1.bf16.msra.mxu1 %v2693_v14  ;;  %2001 = vmatpush1.bf16.msra.mxu0 %v2696_v15  ;;  %v2780_v14 = vld [vmem:[%s3728_s5 + $0x370] ss:$24 sps:$4 sm:$0xff]   ;;  %v2785_v15 = vld [vmem:[%s3728_s5 + $0x44] ss:$24 sps:$4 sm:$0xff]  }
 0x1e1   :  { %1961 = vmatprep.subr.bf16.mxu1 %v2701_v16  ;;  %2002 = vmatprep.subr.bf16.mxu0 %v2704_v17  ;;  %v2788_v16 = vld [vmem:[%s3728_s5 + $0x344] ss:$24 sps:$4 sm:$0xff]   ;;  %v2783_v17 = vld [vmem:[%s3728_s5 + $0x40] ss:$24 sps:$4 sm:$0xff]  }
 0x1e4   :  { %1962 = vmatpush2.bf16.msra.mxu1 %v2699_v18  ;;  %2003 = vmatpush2.bf16.msra.mxu0 %v2702_v19  ;;  %v2786_v18 = vld [vmem:[%s3728_s5 + $0x340] ss:$24 sps:$4 sm:$0xff]   ;;  %v2791_v19 = vld [vmem:[%s3728_s5 + $0x14] ss:$24 sps:$4 sm:$0xff]  }
 0x1e5   :  { %1963 = vmatprep.subr.bf16.mxu1 %v2707_v23  ;;  %2004 = vmatprep.subr.bf16.mxu0 %v2710_v26  ;;  %v2794_v23 = vld [vmem:[%s3728_s5 + $0x314] ss:$24 sps:$4 sm:$0xff]   ;;  %v2789_v26 = vld [vmem:[%s3728_s5 + $0x10] ss:$24 sps:$4 sm:$0xff]  }
 0x1e8   :  { %1964 = vmatpush2.bf16.msra.mxu1 %v2705_v27  ;;  %2005 = vmatpush2.bf16.msra.mxu0 %v2708_v28  ;;  %v2792_v27 = vld [vmem:[%s3728_s5 + $0x310] ss:$24 sps:$4 sm:$0xff]   ;;  %v2797_v28 = vld [vmem:[%s3728_s5 + $0x2e4] ss:$24 sps:$4 sm:$0xff]  }
 0x1e9   :  { %1965 = vmatprep.subr.bf16.mxu1 %v2713_v29  ;;  %2006 = vmatprep.subr.bf16.mxu0 %v2716_v30  ;;  %v2800_v29 = vld [vmem:[%s3728_s5 + $0x5e4] ss:$24 sps:$4 sm:$0xff]   ;;  %v2795_v30 = vld [vmem:[%s3728_s5 + $0x2e0] ss:$24 sps:$4 sm:$0xff]  }
 0x1ec   :  { %1966 = vmatpush2.bf16.msra.mxu1 %v2711_v31  ;;  %2007 = vmatpush2.bf16.msra.mxu0 %v2714_v32  ;;  %v2798_v31 = vld [vmem:[%s3728_s5 + $0x5e0] ss:$24 sps:$4 sm:$0xff]   ;;  %v2803_v32 = vld [vmem:[%s3728_s5 + $0x2b4] ss:$24 sps:$4 sm:$0xff]  }
 0x1ed   :  { %1967 = vmatprep.subr.bf16.mxu1 %v2719_v33  ;;  %2008 = vmatprep.subr.bf16.mxu0 %v2722_v34  ;;  %v2806_v33 = vld [vmem:[%s3728_s5 + $0x5b4] ss:$24 sps:$4 sm:$0xff]   ;;  %v2801_v34 = vld [vmem:[%s3728_s5 + $0x2b0] ss:$24 sps:$4 sm:$0xff]  }
 0x1f0   :  { %1968 = vmatpush2.bf16.msra.mxu1 %v2717_v35  ;;  %2009 = vmatpush2.bf16.msra.mxu0 %v2720_v36  ;;  %v2804_v35 = vld [vmem:[%s3728_s5 + $0x5b0] ss:$24 sps:$4 sm:$0xff]   ;;  %v2809_v36 = vld [vmem:[%s3728_s5 + $0x284] ss:$24 sps:$4 sm:$0xff]  }
 0x1f1   :  { %1969 = vmatprep.subr.bf16.mxu1 %v2725_v37  ;;  %2010 = vmatprep.subr.bf16.mxu0 %v2728_v38  ;;  %v2812_v37 = vld [vmem:[%s3728_s5 + $0x584] ss:$24 sps:$4 sm:$0xff]   ;;  %v2807_v38 = vld [vmem:[%s3728_s5 + $0x280] ss:$24 sps:$4 sm:$0xff]  }
 0x1f4   :  { %1970 = vmatpush2.bf16.msra.mxu1 %v2723_v39  ;;  %2011 = vmatpush2.bf16.msra.mxu0 %v2726_v40  ;;  %v2810_v39 = vld [vmem:[%s3728_s5 + $0x580] ss:$24 sps:$4 sm:$0xff]   ;;  %v2815_v40 = vld [vmem:[%s3728_s5 + $0x254] ss:$24 sps:$4 sm:$0xff]  }
 0x1f5   :  { %1971 = vmatprep.subr.bf16.mxu1 %v2731_v41  ;;  %2012 = vmatprep.subr.bf16.mxu0 %v2734_v42  ;;  %v2818_v41 = vld [vmem:[%s3728_s5 + $0x554] ss:$24 sps:$4 sm:$0xff]   ;;  %v2813_v42 = vld [vmem:[%s3728_s5 + $0x250] ss:$24 sps:$4 sm:$0xff]  }
 0x1f8   :  { %1972 = vmatpush2.bf16.msra.mxu1 %v2729_v43  ;;  %2013 = vmatpush2.bf16.msra.mxu0 %v2732_v44  ;;  %v2816_v43 = vld [vmem:[%s3728_s5 + $0x550] ss:$24 sps:$4 sm:$0xff]   ;;  %v2821_v44 = vld [vmem:[%s3728_s5 + $0x224] ss:$24 sps:$4 sm:$0xff]  }
 0x1f9   :  { %1973 = vmatprep.subr.bf16.mxu1 %v2737_v45  ;;  %2014 = vmatprep.subr.bf16.mxu0 %v2740_v48  ;;  %v2824_v45 = vld [vmem:[%s3728_s5 + $0x524] ss:$24 sps:$4 sm:$0xff]   ;;  %v2819_v48 = vld [vmem:[%s3728_s5 + $0x220] ss:$24 sps:$4 sm:$0xff]  }
 0x1fc   :  { %1974 = vmatpush2.bf16.msra.mxu1 %v2735_v49  ;;  %2015 = vmatpush2.bf16.msra.mxu0 %v2738_v52  ;;  %v2822_v49 = vld [vmem:[%s3728_s5 + $0x520] ss:$24 sps:$4 sm:$0xff]   ;;  %v2827_v52 = vld [vmem:[%s3728_s5 + $0x1f4] ss:$24 sps:$4 sm:$0xff]  }
 0x1fd   :  { %1975 = vmatprep.subr.bf16.mxu1 %v2743_v53  ;;  %2016 = vmatprep.subr.bf16.mxu0 %v2746_v54  ;;  %v2830_v53 = vld [vmem:[%s3728_s5 + $0x4f4] ss:$24 sps:$4 sm:$0xff]   ;;  %v2825_v54 = vld [vmem:[%s3728_s5 + $0x1f0] ss:$24 sps:$4 sm:$0xff]  }
 0x200   :  { %1976 = vmatpush2.bf16.msra.mxu1 %v2741_v55  ;;  %2017 = vmatpush2.bf16.msra.mxu0 %v2744_v56  ;;  %v2828_v55 = vld [vmem:[%s3728_s5 + $0x4f0] ss:$24 sps:$4 sm:$0xff]   ;;  %v2833_v56 = vld [vmem:[%s3728_s5 + $0x1c4] ss:$24 sps:$4 sm:$0xff]  }
 0x201   :  { %2027 = vmatprep.subr.bf16.mxu1 %v2749_v57  ;;  %2068 = vmatprep.subr.bf16.mxu0 %v2752_v58  ;;  %v2836_v57 = vld [vmem:[%s3728_s5 + $0x4c4] ss:$24 sps:$4 sm:$0xff]   ;;  %v2831_v58 = vld [vmem:[%s3728_s5 + $0x1c0] ss:$24 sps:$4 sm:$0xff]  }
 0x203   :  { %1978 = vmatmul.mubr.bf16.vlgmr.msra.gmra.mxu1 %v3306_v50  ;;  %2019 = vmatmul.mubr.bf16.vlgmr.msra.gmra.mxu0 %v3308_v51 }
 0x204   :  { %2028 = vmatpush1.bf16.msra.mxu1 %v2747_v59  ;;  %2059 = vmatprep.mubr.bf16.mxu1 %v3296_v46  ;;  %v2764_v46 = vld [vmem:[%s3728_s5 + $0x404] ss:$24 sps:$4 sm:$0xff]   ;;  %v2834_v59 = vld [vmem:[%s3728_s5 + $0x4c0] ss:$24 sps:$4 sm:$0xff]  }
 0x205   :  { %2069 = vmatpush1.bf16.msra.mxu0 %v2750_v60  ;;  %2100 = vmatprep.mubr.bf16.mxu0 %v3298_v47  ;;  %v2762_v47 = vld [vmem:[%s3728_s5 + $0x400] ss:$24 sps:$4 sm:$0xff]   ;;  %v2839_v60 = vld [vmem:[%s3728_s5 + $0x194] ss:$24 sps:$4 sm:$0xff]  }
 0x206   :  { %2029 = vmatprep.subr.bf16.mxu1 %v2755_v61  ;;  %2070 = vmatprep.subr.bf16.mxu0 %v2758_v62  ;;  %v2842_v61 = vld [vmem:[%s3728_s5 + $0x494] ss:$24 sps:$4 sm:$0xff]   ;;  %v2837_v62 = vld [vmem:[%s3728_s5 + $0x190] ss:$24 sps:$4 sm:$0xff]  }
 0x208   :  { %2030 = vmatpush1.bf16.msra.mxu1 %v2753_v63  ;;  %v2840_v63 = vld [vmem:[%s3728_s5 + $0x490] ss:$24 sps:$4 sm:$0xff]  }
 0x209   :  { %2071 = vmatpush1.bf16.msra.mxu0 %v2756_v0  ;;  %2031 = vmatprep.subr.bf16.mxu1 %v2761_v1  ;;  %v871_v0 = vld [vmem:[%s3731_s6] sm:$0x3f] }
 0x20a   :  { %2072 = vmatprep.subr.bf16.mxu0 %v2764_v46  ;;  %v876_v1 = vrot.slane %v871_v0, %v488_v21  ;;  %v880_v46 = vrot.slane %v871_v0, %v492_v24  ;;  %v884_v21 = vrot.slane %v871_v0, %v496_v22  ;;  %v888_v24 = vrot.slane %v871_v0, %v500_v25 }
 0x20b   :  { %v895_v22 = vsub.s32 5, %v3279_v20 }
 0x20c   :  { %2032 = vmatpush1.bf16.msra.mxu1 %v2759_v2 }
 0x20d   :  { %2073 = vmatpush1.bf16.msra.mxu0 %v2762_v47  ;;  %2033 = vmatprep.subr.bf16.mxu1 %v2767_v3  ;;  %v896_v25 = vrot.slane %v871_v0, %v895_v22 }
 0x20e   :  { %2074 = vmatprep.subr.bf16.mxu0 %v2770_v4 }
 0x210   :  { %2034 = vmatpush1.bf16.msra.mxu1 %v2765_v5 }
 0x211   :  { %2075 = vmatpush1.bf16.msra.mxu0 %v2768_v6  ;;  %2035 = vmatprep.subr.bf16.mxu1 %v2773_v7 }
 0x212   :  { %2076 = vmatprep.subr.bf16.mxu0 %v2776_v8 }
 0x214   :  { %2036 = vmatpush1.bf16.msra.mxu1 %v2771_v9 }
 0x215   :  { %2077 = vmatpush1.bf16.msra.mxu0 %v2774_v10  ;;  %2037 = vmatprep.subr.bf16.mxu1 %v2779_v11 }
 0x216   :  { %2078 = vmatprep.subr.bf16.mxu0 %v2782_v12 }
 0x218   :  { %2038 = vmatpush1.bf16.msra.mxu1 %v2777_v13 }
 0x219   :  { %2079 = vmatpush1.bf16.msra.mxu0 %v2780_v14  ;;  %2039 = vmatprep.subr.bf16.mxu1 %v2785_v15 }
 0x21a   :  { %2080 = vmatprep.subr.bf16.mxu0 %v2788_v16 }
 0x21c   :  { %2040 = vmatpush1.bf16.msra.mxu1 %v2783_v17 }
 0x21d   :  { %2081 = vmatpush1.bf16.msra.mxu0 %v2786_v18  ;;  %2041 = vmatprep.subr.bf16.mxu1 %v2791_v19 }
 0x21e   :  { %2082 = vmatprep.subr.bf16.mxu0 %v2794_v23 }
 0x220   :  { %2042 = vmatpush1.bf16.msra.mxu1 %v2789_v26 }
 0x221   :  { %2083 = vmatpush1.bf16.msra.mxu0 %v2792_v27  ;;  %2043 = vmatprep.subr.bf16.mxu1 %v2797_v28  ;;  %v891_v28 = vsub.s32 4, %v3279_v20 }
 0x222   :  { %2084 = vmatprep.subr.bf16.mxu0 %v2800_v29 }
 0x223   :  { %v892_v29 = vrot.slane %v871_v0, %v891_v28 }
 0x224   :  { %2044 = vmatpush2.bf16.msra.mxu1 %v2795_v30 }
 0x225   :  { %2085 = vmatpush2.bf16.msra.mxu0 %v2798_v31  ;;  %2045 = vmatprep.subr.bf16.mxu1 %v2803_v32 }
 0x226   :  { %2086 = vmatprep.subr.bf16.mxu0 %v2806_v33 }
 0x228   :  { %2046 = vmatpush2.bf16.msra.mxu1 %v2801_v34 }
 0x229   :  { %2087 = vmatpush2.bf16.msra.mxu0 %v2804_v35  ;;  %2047 = vmatprep.subr.bf16.mxu1 %v2809_v36 }
 0x22a   :  { %2088 = vmatprep.subr.bf16.mxu0 %v2812_v37 }
 0x22c   :  { %2048 = vmatpush2.bf16.msra.mxu1 %v2807_v38 }
 0x22d   :  { %2089 = vmatpush2.bf16.msra.mxu0 %v2810_v39  ;;  %2049 = vmatprep.subr.bf16.mxu1 %v2815_v40 }
 0x22e   :  { %2090 = vmatprep.subr.bf16.mxu0 %v2818_v41 }
 0x230   :  { %2050 = vmatpush2.bf16.msra.mxu1 %v2813_v42 }
 0x231   :  { %2091 = vmatpush2.bf16.msra.mxu0 %v2816_v43  ;;  %2051 = vmatprep.subr.bf16.mxu1 %v2821_v44 }
 0x232   :  { %2092 = vmatprep.subr.bf16.mxu0 %v2824_v45 }
 0x234   :  { %2052 = vmatpush2.bf16.msra.mxu1 %v2819_v48 }
 0x235   :  { %2093 = vmatpush2.bf16.msra.mxu0 %v2822_v49  ;;  %2053 = vmatprep.subr.bf16.mxu1 %v2827_v52 }
 0x236   :  { %2094 = vmatprep.subr.bf16.mxu0 %v2830_v53 }
 0x238   :  { %2054 = vmatpush2.bf16.msra.mxu1 %v2825_v54 }
 0x239   :  { %2095 = vmatpush2.bf16.msra.mxu0 %v2828_v55  ;;  %2055 = vmatprep.subr.bf16.mxu1 %v2833_v56 }
 0x23a   :  { %2096 = vmatprep.subr.bf16.mxu0 %v2836_v57 }
 0x23c   :  { %2056 = vmatpush2.bf16.msra.mxu1 %v2831_v58 }
 0x23d   :  { %2097 = vmatpush2.bf16.msra.mxu0 %v2834_v59  ;;  %2057 = vmatprep.subr.bf16.mxu1 %v2839_v60 }
 0x23e   :  { %2098 = vmatprep.subr.bf16.mxu0 %v2842_v61 }
 0x240   :  { %2058 = vmatpush2.bf16.msra.mxu1 %v2837_v62 }
 0x241   :  { %2099 = vmatpush2.bf16.msra.mxu0 %v2840_v63 }
 0x243   :  { %2060 = vmatmul.mubr.bf16.vlgmr.msra.gmra.mxu1 %v3306_v50 }
 0x244   :  { %2101 = vmatmul.mubr.bf16.vlgmr.msra.gmra.mxu0 %v3308_v51 }
 0x283   :  { %v1897_v2 = vpop.f32.mrf.mxu1  ;;  %v1938_v47 = vpop.f32.mrf.mxu0 }
 0x284   :  { %v1898_v3 = vadd.f32 %v1897_v2, %v876_v1 }
 0x285   :  { %v1899_v4 = vpop.f32.mrf.mxu1  ;;  %v1940_v5 = vpop.f32.mrf.mxu0 }
 0x286   :  { %v1939_v6 = vadd.f32 %v1938_v47, %v1898_v3  ;;  %v1900_v7 = vadd.f32 %v1899_v4, %v880_v46 }
 0x287   :  { %v1901_v50 = vpop.f32.mrf.mxu1  ;;  %v1942_v8 = vpop.f32.mrf.mxu0 }
 0x288   :  { %2109 = vmax.xlane.f32.xlu0 %v1939_v6  ;;  %v1941_v10 = vadd.f32 %v1940_v5, %v1900_v7 }
 0x289   :  { %v1902_v51 = vpop.f32.mrf.mxu1  ;;  %v1943_v9 = vpop.f32.mrf.mxu0 }
 0x28c   :  { %2119 = vmax.xlane.f32.xlu0 %v1941_v10 }
 0x2c3   :  { %v1979_v11 = vpop.f32.mrf.mxu1  ;;  %v2020_v12 = vpop.f32.mrf.mxu0 }
 0x2c4   :  { %v1980_v13 = vadd.f32 %v1979_v11, %v884_v21 }
 0x2c5   :  { %v1981_v14 = vpop.f32.mrf.mxu1  ;;  %v2022_v15 = vpop.f32.mrf.mxu0 }
 0x2c6   :  { %v2021_v16 = vadd.f32 %v2020_v12, %v1980_v13  ;;  %v1982_v17 = vadd.f32 %v1981_v14, %v888_v24 }
 0x2c7   :  { %v1983_v18 = vpop.f32.mrf.mxu1  ;;  %v2024_v19 = vpop.f32.mrf.mxu0 }
 0x2c8   :  { %2129 = vmax.xlane.f32.xlu1 %v2021_v16  ;;  %v2023_v27 = vadd.f32 %v2022_v15, %v1982_v17 }
 0x2c9   :  { %v1984_v23 = vpop.f32.mrf.mxu1  ;;  %v2025_v26 = vpop.f32.mrf.mxu0 }
 0x2cc   :  { %2139 = vmax.xlane.f32.xlu1 %v2023_v27 }
 0x303   :  { %v2061_v30 = vpop.f32.mrf.mxu1 }
 0x304   :  { %v2062_v31 = vadd.f32 %v2061_v30, %v892_v29  ;;  %v2102_v32 = vpop.f32.mrf.mxu0 }
 0x305   :  { %v2063_v33 = vpop.f32.mrf.mxu1 }
 0x306   :  { %v2103_v34 = vadd.f32 %v2102_v32, %v2062_v31  ;;  %v2064_v35 = vadd.f32 %v2063_v33, %v896_v25  ;;  %v2104_v36 = vpop.f32.mrf.mxu0 }
 0x307   :  { %v2065_v37 = vpop.f32.mrf.mxu1 }
 0x308   :  { %v2105_v38 = vadd.f32 %v2104_v36, %v2064_v35  ;;  %v2106_v39 = vpop.f32.mrf.mxu0  ;;  %2149 = vmax.xlane.f32.xlu0 %v2103_v34 }
 0x309   :  { %v2066_v40 = vpop.f32.mrf.mxu1 }
 0x30a   :  { %v2107_v41 = vpop.f32.mrf.mxu0  ;;  %2159 = vmax.xlane.f32.xlu1 %v2105_v38 }
 0x311   :  { %v2110_v42 = vpop.xlane.xlu0 %2109 }
 0x312   :  { %v2111_v43 = vsub.f32 %v1939_v6, %v2110_v42 }
 0x314   :  { %v2112_v44 = vmul.f32 1.442695, %v2111_v43 }
 0x315   :  { %v2120_v20 = vpop.xlane.xlu0 %2119 }
 0x316   :  { %2843 = vpow2.f32 %v2112_v44  ;;  %v2121_v45 = vsub.f32 %v1941_v10, %v2120_v20 }
 0x318   :  { %v2122_v48 = vmul.f32 1.442695, %v2121_v45 }
 0x31a   :  { %2845 = vpow2.f32 %v2122_v48 }
 0x323   :  { %v2844_v49 = vpop.eup %2843 }
 0x324   :  { %2114 = vadd.xlane.f32.xlu0 %v2844_v49 }
 0x327   :  { %v2846_v52 = vpop.eup %2845 }
 0x328   :  { %2124 = vadd.xlane.f32.xlu1 %v2846_v52 }
 0x351   :  { %v2130_v53 = vpop.xlane.xlu1 %2129 }
 0x352   :  { %v2131_v54 = vsub.f32 %v2021_v16, %v2130_v53 }
 0x354   :  { %v2132_v55 = vmul.f32 1.442695, %v2131_v54 }
 0x355   :  { %v2140_v56 = vpop.xlane.xlu1 %2139 }
 0x356   :  { %2847 = vpow2.f32 %v2132_v55  ;;  %v2141_v57 = vsub.f32 %v2023_v27, %v2140_v56 }
 0x358   :  { %v2142_v58 = vmul.f32 1.442695, %v2141_v57 }
 0x35a   :  { %2849 = vpow2.f32 %v2142_v58 }
 0x363   :  { %v2848_v59 = vpop.eup %2847 }
 0x364   :  { %2134 = vadd.xlane.f32.xlu0 %v2848_v59 }
 0x367   :  { %v2850_v60 = vpop.eup %2849 }
 0x368   :  { %2144 = vadd.xlane.f32.xlu1 %v2850_v60 }
 0x391   :  { %v2150_v61 = vpop.xlane.xlu0 %2149 }
 0x392   :  { %v2151_v62 = vsub.f32 %v2103_v34, %v2150_v61 }
 0x393   :  { %v2160_v63 = vpop.xlane.xlu1 %2159 }
 0x394   :  { %v2152_v0 = vmul.f32 1.442695, %v2151_v62  ;;  %v2161_v1 = vsub.f32 %v2105_v38, %v2160_v63 }
 0x396   :  { %2851 = vpow2.f32 %v2152_v0  ;;  %v2162_v46 = vmul.f32 1.442695, %v2161_v1 }
 0x398   :  { %2853 = vpow2.f32 %v2162_v46 }
 0x3a3   :  { %v2852_v2 = vpop.eup %2851 }
 0x3a4   :  { %2154 = vadd.xlane.f32.xlu0 %v2852_v2 }
 0x3a5   :  { %v2854_v47 = vpop.eup %2853 }
 0x3a6   :  { %2164 = vadd.xlane.f32.xlu1 %v2854_v47 }
 0x3ad   :  { %v2115_v3 = vpop.xlane.xlu0 %2114 }
 0x3ae   :  { %2855 = vrcp.f32 %v2115_v3 }
 0x3b1   :  { %v2125_v4 = vpop.xlane.xlu1 %2124 }
 0x3b2   :  { %2857 = vrcp.f32 %v2125_v4 }
 0x3bb   :  { %v2856_v5 = vpop.eup %2855 }
 0x3bc   :  { %v2117_v6 = vmul.f32 %v2856_v5, %v2844_v49 }
 0x3be   :  { %2118 = vst [vmem:[%s3732_s7] sm:$0xff] %v2117_v6 }
 0x3bf   :  { %v2858_v7 = vpop.eup %2857 }
 0x3c0   :  { %v2127_v50 = vmul.f32 %v2858_v7, %v2846_v52 }
 0x3c2   :  { %2128 = vst [vmem:[%s3732_s7 + $0x8] sm:$0xff] %v2127_v50 }
 0x3ed   :  { %v2135_v8 = vpop.xlane.xlu0 %2134 }
 0x3ee   :  { %2859 = vrcp.f32 %v2135_v8 }
 0x3f1   :  { %v2145_v51 = vpop.xlane.xlu1 %2144 }
 0x3f2   :  { %2861 = vrcp.f32 %v2145_v51 }
 0x3fb   :  { %v2860_v9 = vpop.eup %2859 }
 0x3fc   :  { %v2137_v10 = vmul.f32 %v2860_v9, %v2848_v59 }
 0x3fe   :  { %2138 = vst [vmem:[%s3732_s7 + $0x10] sm:$0xff] %v2137_v10 }
 0x3ff   :  { %v2862_v21 = vpop.eup %2861 }
 0x400   :  { %v2147_v24 = vmul.f32 %v2862_v21, %v2850_v60 }
 0x402   :  { %2148 = vst [vmem:[%s3732_s7 + $0x18] sm:$0xff] %v2147_v24 }
 0x42d   :  { %v2155_v11 = vpop.xlane.xlu0 %2154 }
 0x42e   :  { %2863 = vrcp.f32 %v2155_v11 }
 0x42f   :  { %v2165_v12 = vpop.xlane.xlu1 %2164 }
 0x430   :  { %2865 = vrcp.f32 %v2165_v12 }
 0x43b   :  { %v2864_v13 = vpop.eup %2863 }
 0x43c   :  { %v2157_v14 = vmul.f32 %v2864_v13, %v2852_v2 }
 0x43d   :  { %v2866_v15 = vpop.eup %2865 }
 0x43e   :  { %2158 = vst [vmem:[%s3732_s7 + $0x20] sm:$0xff] %v2157_v14  ;;  %v2167_v16 = vmul.f32 %v2866_v15, %v2854_v47 }
 0x440   :  { %2168 = vst [vmem:[%s3732_s7 + $0x28] sm:$0xff] %v2167_v16 }

</bundles_post_ra>
